<compile_context>
chip_gen: v7x
topology: tpu7x:2x2x1
jax: 0.10.0
libtpu: 0.0.40
codegen_flags: <defaults>
</compile_context>

<pallas_src>
import functools

import jax
import jax.numpy as jnp
import numpy as np
from jax.experimental import pallas as pl
from jax.experimental.pallas import tpu as pltpu


def _round_up(x, m):
    return ((x + m - 1) // m) * m


def _default_grid_steps():
    """1 grid step on single-TC chips (v5e/v6e); 2 parallel steps on v7x."""
    try:
        kind = str(jax.devices()[0].device_kind).lower()
    except Exception:
        return 1
    return 2 if "7" in kind else 1


def critic_kernel(x_ref, w1_ref, b1_ref, w2a_ref, w2b_ref, b2_ref,
                  w3_ref, b3_ref, out_ref, *, state_size, chunk):
    tb = x_ref.shape[0]
    b3 = b3_ref[0, 0]

    # Static, unrolled sub-tiling of the batch tile: bounds the h1/h2 working
    # set per chunk while keeping a single grid step (static offsets only, so
    # every slice / store is a clean aligned vector op).
    for r0 in range(0, tb, chunk):
        x = x_ref[r0:r0 + chunk, :]
        st = x[:, :state_size].astype(jnp.bfloat16)
        ac = x[:, state_size:].astype(jnp.bfloat16)

        # Layer 0: Linear(stateSize -> H1) + ReLU (bf16 MXU, f32 accumulate).
        h1 = jnp.dot(st, w1_ref[...],
                     preferred_element_type=jnp.float32) + b1_ref[...]
        h1 = jnp.maximum(h1, 0.0)

        # Layer 1: concat(h1, action) -> Linear(H1+A -> H2) + ReLU.
        # Concat folded into split weights (W2a, W2b).  The K=A contraction is
        # kept on the (otherwise idle) MXU -- the costly part flagged in the
        # review (a second double-buffered input DMA stream) is already gone
        # because state and action arrive fused in one tile.
        h2 = (jnp.dot(h1.astype(jnp.bfloat16), w2a_ref[...],
                      preferred_element_type=jnp.float32)
              + jnp.dot(ac, w2b_ref[...],
                        preferred_element_type=jnp.float32)
              + b2_ref[...])
        h2 = jnp.maximum(h2, 0.0)

        # Output head (H2 -> 1), lane-dense: XLU transpose of h2 (idle slot),
        # VPU multiply by the (H2, 1) weight column, sublane reduction ->
        # a (1, chunk) row stored with full-lane unmasked vst.
        q = jnp.sum(h2.T * w3_ref[...], axis=0, keepdims=True) + b3
        out_ref[0:1, r0:r0 + chunk] = q


def critic_forward(state, action, params, *, grid_steps=None, chunk_rows=256):
    """Critic forward pass.

    state:  (B, stateSize) float32
    action: (B, actionSize) float32
    params: (w1, b1, w2a, w2b, b2, w3, b3) as produced by init_critic_params
    returns (B, 1) float32
    """
    B, S = state.shape
    A = action.shape[1]
    w1, b1, w2a, w2b, b2, w3, b3 = params
    H1 = w1.shape[1]
    H2 = w2a.shape[1]

    if grid_steps is None:
        grid_steps = _default_grid_steps()
    grid_steps = max(1, int(grid_steps))

    # Single fused input stream: x = [state || action].
    x = jnp.concatenate([state, action], axis=1)

    # Pad the batch so every grid step gets a lane-dense (multiple-of-128 row)
    # tile; padded rows are computed and sliced off (cheaper than masking).
    Bp = _round_up(B, grid_steps * 128)
    if Bp != B:
        x = jnp.pad(x, ((0, Bp - B), (0, 0)))
    tb = Bp // grid_steps

    chunk = chunk_rows if (chunk_rows <= tb and tb % chunk_rows == 0) else 128
    chunk = min(chunk, tb)

    def resident(shape):     # same block every step -> stays resident in VMEM
        return pl.BlockSpec(shape, lambda i: (0,) * len(shape))

    in_specs = [
        pl.BlockSpec((tb, S + A), lambda i: (i, 0)),  # fused state||action
        resident((S, H1)),                            # w1
        resident((1, H1)),                            # b1
        resident((H1, H2)),                           # w2a
        resident((A, H2)),                            # w2b
        resident((1, H2)),                            # b2
        resident((H2, 1)),                            # w3 (column)
        pl.BlockSpec(memory_space=pltpu.SMEM),        # b3 scalar
    ]
    out_specs = pl.BlockSpec((1, tb), lambda i: (0, i))

    flops = 2 * Bp * (S * H1 + (H1 + A) * H2 + H2)
    bytes_accessed = (w1.size * w1.dtype.itemsize
                      + w2a.size * w2a.dtype.itemsize
                      + w2b.size * w2b.dtype.itemsize
                      + (H1 + H2 + H2 + 1) * 4
                      + Bp * (S + A + 1) * 4)

    kernel = functools.partial(critic_kernel, state_size=S, chunk=chunk)

    out = pl.pallas_call(
        kernel,
        out_shape=jax.ShapeDtypeStruct((1, Bp), jnp.float32),
        grid=(grid_steps,),
        in_specs=in_specs,
        out_specs=out_specs,
        compiler_params=pltpu.CompilerParams(
            dimension_semantics=("parallel",)),
        cost_estimate=pl.CostEstimate(
            flops=flops, transcendentals=0, bytes_accessed=bytes_accessed),
    )(x, w1, b1, w2a, w2b, b2, w3, b3)

    return out[0, :B, None]   # (B, 1)


def init_critic_params(key, state_size, action_size, hidden_layers=(256, 128)):
    """Init mirroring Critic.reset_parameters / nn.Linear defaults.

    hidden_init: lim = 1/sqrt(weight.size(0)) = 1/sqrt(out_features);
    biases keep the nn.Linear default uniform(-1/sqrt(in_features), ...).
    outLayer weight uses uniform(-0.003, 0.003).

    Storage layout for the kernel:
      w1:  (stateSize, H1)       bf16
      w2a: (H1, H2)              bf16   (rows of W2 that multiply h1)
      w2b: (actionSize, H2)      bf16   (rows of W2 that multiply action)
      w3:  (H2, 1)               f32    (pre-transposed column for the VPU head)
      b1:  (1, H1), b2: (1, H2), b3: (1, 1)   f32
    """
    h1, h2 = hidden_layers
    k = jax.random.split(key, 6)

    lim1_w = 1.0 / np.sqrt(h1)
    lim1_b = 1.0 / np.sqrt(state_size)
    w1 = jax.random.uniform(k[0], (state_size, h1), jnp.float32, -lim1_w, lim1_w)
    b1 = jax.random.uniform(k[1], (1, h1), jnp.float32, -lim1_b, lim1_b)

    in2 = h1 + action_size
    lim2_w = 1.0 / np.sqrt(h2)
    lim2_b = 1.0 / np.sqrt(in2)
    w2 = jax.random.uniform(k[2], (in2, h2), jnp.float32, -lim2_w, lim2_w)
    w2a, w2b = w2[:h1], w2[h1:]
    b2 = jax.random.uniform(k[3], (1, h2), jnp.float32, -lim2_b, lim2_b)

    lim3_b = 1.0 / np.sqrt(h2)
    w3 = jax.random.uniform(k[4], (h2, 1), jnp.float32, -0.003, 0.003)
    b3 = jax.random.uniform(k[5], (1, 1), jnp.float32, -lim3_b, lim3_b)

    return (w1.astype(jnp.bfloat16), b1,
            w2a.astype(jnp.bfloat16), w2b.astype(jnp.bfloat16), b2,
            w3, b3)


def critic_reference(state, action, params):
    """Pure-JAX f32 reference (weights upcast from their stored dtype)."""
    w1, b1, w2a, w2b, b2, w3, b3 = params
    w1 = w1.astype(jnp.float32)
    w2a = w2a.astype(jnp.float32)
    w2b = w2b.astype(jnp.float32)
    h1 = jax.nn.relu(state @ w1 + b1)
    h2 = jax.nn.relu(h1 @ w2a + action @ w2b + b2)
    return h2 @ w3 + b3


if __name__ == "__main__":
    B = 512              # exercises the in-kernel sub-tiling (and the grid on v7x)
    STATE_SIZE = 32
    ACTION_SIZE = 8
    HIDDEN = (256, 128)  # module defaults

    key = jax.random.PRNGKey(0)
    k_param, k_state, k_action = jax.random.split(key, 3)

    params = init_critic_params(k_param, STATE_SIZE, ACTION_SIZE, HIDDEN)
    state = jax.random.normal(k_state, (B, STATE_SIZE), jnp.float32)
    action = jax.random.normal(k_action, (B, ACTION_SIZE), jnp.float32)

    fwd = jax.jit(critic_forward)
    out = jax.block_until_ready(fwd(state, action, params))

    ref = critic_reference(state, action, params)
    # bf16 MXU operands => loosened tolerance vs the f32 reference.
    np.testing.assert_allclose(np.asarray(out), np.asarray(ref),
                               rtol=3e-2, atol=1e-2)

    assert out.shape == (B, 1)
    print("KERNEL_OK")
</pallas_src>

<mosaic_0001>
module attributes {stable_mosaic.version = 11 : i64} {
  func.func @critic_kernel(%arg0: i32, %arg1: memref<512x40xf32, #tpu.memory_space<vmem>>, %arg2: memref<32x256xbf16, #tpu.memory_space<vmem>>, %arg3: memref<1x256xf32, #tpu.memory_space<vmem>>, %arg4: memref<256x128xbf16, #tpu.memory_space<vmem>>, %arg5: memref<8x128xbf16, #tpu.memory_space<vmem>>, %arg6: memref<1x128xf32, #tpu.memory_space<vmem>>, %arg7: memref<128x1xf32, #tpu.memory_space<vmem>>, %arg8: memref<1x1xf32, #tpu.memory_space<smem>>, %arg9: memref<1x512xf32, #tpu.memory_space<vmem>>) attributes {dimension_semantics = [#tpu.dimension_semantics<parallel>], iteration_bounds = array<i64: 1>, scalar_prefetch = 0 : i64, scratch_operands = 0 : i64, tpu.core_type = #tpu.core_type<tc>, window_params = [{transform_indices = @transform_0, window_bounds = array<i64: 512, 40>}, {pipeline_mode = #tpu.pipeline_mode<synchronous>, transform_indices = @transform_1, window_bounds = array<i64: 32, 256>}, {pipeline_mode = #tpu.pipeline_mode<synchronous>, transform_indices = @transform_2, window_bounds = array<i64: 1, 256>}, {pipeline_mode = #tpu.pipeline_mode<synchronous>, transform_indices = @transform_3, window_bounds = array<i64: 256, 128>}, {pipeline_mode = #tpu.pipeline_mode<synchronous>, transform_indices = @transform_4, window_bounds = array<i64: 8, 128>}, {pipeline_mode = #tpu.pipeline_mode<synchronous>, transform_indices = @transform_5, window_bounds = array<i64: 1, 128>}, {pipeline_mode = #tpu.pipeline_mode<synchronous>, transform_indices = @transform_6, window_bounds = array<i64: 128, 1>}, {transform_indices = @transform_7, window_bounds = array<i64: 1, 1>}, {transform_indices = @transform_8, window_bounds = array<i64: 1, 512>}]} {
    %c0 = arith.constant 0 : index
    %c0_0 = arith.constant 0 : index
    %0 = memref.load %arg8[%c0, %c0_0] : memref<1x1xf32, #tpu.memory_space<smem>>
    %c0_1 = arith.constant 0 : index
    %c0_2 = arith.constant 0 : index
    %1 = vector.load %arg1[%c0_1, %c0_2] : memref<512x40xf32, #tpu.memory_space<vmem>>, vector<256x40xf32>
    %2 = vector.extract_strided_slice %1 {offsets = [0, 0], sizes = [256, 32], strides = [1, 1]} : vector<256x40xf32> to vector<256x32xf32>
    %3 = arith.truncf %2 : vector<256x32xf32> to vector<256x32xbf16>
    %4 = vector.extract_strided_slice %1 {offsets = [0, 32], sizes = [256, 8], strides = [1, 1]} : vector<256x40xf32> to vector<256x8xf32>
    %5 = arith.truncf %4 : vector<256x8xf32> to vector<256x8xbf16>
    %c0_3 = arith.constant 0 : index
    %c0_4 = arith.constant 0 : index
    %6 = vector.load %arg2[%c0_3, %c0_4] : memref<32x256xbf16, #tpu.memory_space<vmem>>, vector<32x256xbf16>
    %cst = arith.constant dense<0.000000e+00> : vector<256x256xf32>
    %7 = tpu.matmul %3, %6, %cst {dimension_numbers = #tpu.dot_dimension_numbers<[1], [0], [0], [1], [0, 0, 1, 1], [], []>} : vector<256x32xbf16>, vector<32x256xbf16>, vector<256x256xf32> -> vector<256x256xf32>
    %c0_5 = arith.constant 0 : index
    %c0_6 = arith.constant 0 : index
    %8 = vector.load %arg3[%c0_5, %c0_6] : memref<1x256xf32, #tpu.memory_space<vmem>>, vector<1x256xf32>
    %9 = vector.broadcast %8 : vector<1x256xf32> to vector<256x256xf32>
    %10 = arith.addf %7, %9 : vector<256x256xf32>
    %cst_7 = arith.constant 0.000000e+00 : f32
    %11 = vector.broadcast %cst_7 : f32 to vector<256x256xf32>
    %12 = arith.maximumf %10, %11 : vector<256x256xf32>
    %13 = arith.truncf %12 : vector<256x256xf32> to vector<256x256xbf16>
    %c0_8 = arith.constant 0 : index
    %c0_9 = arith.constant 0 : index
    %14 = vector.load %arg4[%c0_8, %c0_9] : memref<256x128xbf16, #tpu.memory_space<vmem>>, vector<256x128xbf16>
    %cst_10 = arith.constant dense<0.000000e+00> : vector<256x128xf32>
    %15 = tpu.matmul %13, %14, %cst_10 {dimension_numbers = #tpu.dot_dimension_numbers<[1], [0], [0], [1], [0, 0, 1, 1], [], []>} : vector<256x256xbf16>, vector<256x128xbf16>, vector<256x128xf32> -> vector<256x128xf32>
    %c0_11 = arith.constant 0 : index
    %c0_12 = arith.constant 0 : index
    %16 = vector.load %arg5[%c0_11, %c0_12] : memref<8x128xbf16, #tpu.memory_space<vmem>>, vector<8x128xbf16>
    %cst_13 = arith.constant dense<0.000000e+00> : vector<256x128xf32>
    %17 = tpu.matmul %5, %16, %cst_13 {dimension_numbers = #tpu.dot_dimension_numbers<[1], [0], [0], [1], [0, 0, 1, 1], [], []>} : vector<256x8xbf16>, vector<8x128xbf16>, vector<256x128xf32> -> vector<256x128xf32>
    %18 = arith.addf %15, %17 : vector<256x128xf32>
    %c0_14 = arith.constant 0 : index
    %c0_15 = arith.constant 0 : index
    %19 = vector.load %arg6[%c0_14, %c0_15] : memref<1x128xf32, #tpu.memory_space<vmem>>, vector<1x128xf32>
    %20 = vector.broadcast %19 : vector<1x128xf32> to vector<256x128xf32>
    %21 = arith.addf %18, %20 : vector<256x128xf32>
    %cst_16 = arith.constant 0.000000e+00 : f32
    %22 = vector.broadcast %cst_16 : f32 to vector<256x128xf32>
    %23 = arith.maximumf %21, %22 : vector<256x128xf32>
    %24 = tpu.transpose %23, [1, 0] : vector<256x128xf32> -> vector<128x256xf32>
    %c0_17 = arith.constant 0 : index
    %c0_18 = arith.constant 0 : index
    %25 = vector.load %arg7[%c0_17, %c0_18] : memref<128x1xf32, #tpu.memory_space<vmem>>, vector<128x1xf32>
    %26 = vector.broadcast %25 : vector<128x1xf32> to vector<128x256xf32>
    %27 = arith.mulf %24, %26 : vector<128x256xf32>
    %cst_19 = arith.constant dense<0.000000e+00> : vector<256xf32>
    %28 = vector.multi_reduction <add>, %27, %cst_19 [0] : vector<128x256xf32> to vector<256xf32>
    %29 = vector.shape_cast %28 : vector<256xf32> to vector<1x256xf32>
    %30 = vector.broadcast %0 : f32 to vector<1x256xf32>
    %31 = arith.addf %29, %30 : vector<1x256xf32>
    %c0_20 = arith.constant 0 : index
    %c0_21 = arith.constant 0 : index
    %32 = vector.load %arg9[%c0_20, %c0_21] : memref<1x512xf32, #tpu.memory_space<vmem>>, vector<1x256xf32>
    tpu.vector_store %arg9[%c0_20, %c0_21], %31 {strides = array<i32>} : memref<1x512xf32, #tpu.memory_space<vmem>>, vector<1x256xf32>,
    %c256 = arith.constant 256 : index
    %c0_22 = arith.constant 0 : index
    %33 = vector.load %arg1[%c256, %c0_22] : memref<512x40xf32, #tpu.memory_space<vmem>>, vector<256x40xf32>
    %34 = vector.extract_strided_slice %33 {offsets = [0, 0], sizes = [256, 32], strides = [1, 1]} : vector<256x40xf32> to vector<256x32xf32>
    %35 = arith.truncf %34 : vector<256x32xf32> to vector<256x32xbf16>
    %36 = vector.extract_strided_slice %33 {offsets = [0, 32], sizes = [256, 8], strides = [1, 1]} : vector<256x40xf32> to vector<256x8xf32>
    %37 = arith.truncf %36 : vector<256x8xf32> to vector<256x8xbf16>
    %c0_23 = arith.constant 0 : index
    %c0_24 = arith.constant 0 : index
    %38 = vector.load %arg2[%c0_23, %c0_24] : memref<32x256xbf16, #tpu.memory_space<vmem>>, vector<32x256xbf16>
    %cst_25 = arith.constant dense<0.000000e+00> : vector<256x256xf32>
    %39 = tpu.matmul %35, %38, %cst_25 {dimension_numbers = #tpu.dot_dimension_numbers<[1], [0], [0], [1], [0, 0, 1, 1], [], []>} : vector<256x32xbf16>, vector<32x256xbf16>, vector<256x256xf32> -> vector<256x256xf32>
    %c0_26 = arith.constant 0 : index
    %c0_27 = arith.constant 0 : index
    %40 = vector.load %arg3[%c0_26, %c0_27] : memref<1x256xf32, #tpu.memory_space<vmem>>, vector<1x256xf32>
    %41 = vector.broadcast %40 : vector<1x256xf32> to vector<256x256xf32>
    %42 = arith.addf %39, %41 : vector<256x256xf32>
    %cst_28 = arith.constant 0.000000e+00 : f32
    %43 = vector.broadcast %cst_28 : f32 to vector<256x256xf32>
    %44 = arith.maximumf %42, %43 : vector<256x256xf32>
    %45 = arith.truncf %44 : vector<256x256xf32> to vector<256x256xbf16>
    %c0_29 = arith.constant 0 : index
    %c0_30 = arith.constant 0 : index
    %46 = vector.load %arg4[%c0_29, %c0_30] : memref<256x128xbf16, #tpu.memory_space<vmem>>, vector<256x128xbf16>
    %cst_31 = arith.constant dense<0.000000e+00> : vector<256x128xf32>
    %47 = tpu.matmul %45, %46, %cst_31 {dimension_numbers = #tpu.dot_dimension_numbers<[1], [0], [0], [1], [0, 0, 1, 1], [], []>} : vector<256x256xbf16>, vector<256x128xbf16>, vector<256x128xf32> -> vector<256x128xf32>
    %c0_32 = arith.constant 0 : index
    %c0_33 = arith.constant 0 : index
    %48 = vector.load %arg5[%c0_32, %c0_33] : memref<8x128xbf16, #tpu.memory_space<vmem>>, vector<8x128xbf16>
    %cst_34 = arith.constant dense<0.000000e+00> : vector<256x128xf32>
    %49 = tpu.matmul %37, %48, %cst_34 {dimension_numbers = #tpu.dot_dimension_numbers<[1], [0], [0], [1], [0, 0, 1, 1], [], []>} : vector<256x8xbf16>, vector<8x128xbf16>, vector<256x128xf32> -> vector<256x128xf32>
    %50 = arith.addf %47, %49 : vector<256x128xf32>
    %c0_35 = arith.constant 0 : index
    %c0_36 = arith.constant 0 : index
    %51 = vector.load %arg6[%c0_35, %c0_36] : memref<1x128xf32, #tpu.memory_space<vmem>>, vector<1x128xf32>
    %52 = vector.broadcast %51 : vector<1x128xf32> to vector<256x128xf32>
    %53 = arith.addf %50, %52 : vector<256x128xf32>
    %cst_37 = arith.constant 0.000000e+00 : f32
    %54 = vector.broadcast %cst_37 : f32 to vector<256x128xf32>
    %55 = arith.maximumf %53, %54 : vector<256x128xf32>
    %56 = tpu.transpose %55, [1, 0] : vector<256x128xf32> -> vector<128x256xf32>
    %c0_38 = arith.constant 0 : index
    %c0_39 = arith.constant 0 : index
    %57 = vector.load %arg7[%c0_38, %c0_39] : memref<128x1xf32, #tpu.memory_space<vmem>>, vector<128x1xf32>
    %58 = vector.broadcast %57 : vector<128x1xf32> to vector<128x256xf32>
    %59 = arith.mulf %56, %58 : vector<128x256xf32>
    %cst_40 = arith.constant dense<0.000000e+00> : vector<256xf32>
    %60 = vector.multi_reduction <add>, %59, %cst_40 [0] : vector<128x256xf32> to vector<256xf32>
    %61 = vector.shape_cast %60 : vector<256xf32> to vector<1x256xf32>
    %62 = vector.broadcast %0 : f32 to vector<1x256xf32>
    %63 = arith.addf %61, %62 : vector<1x256xf32>
    %c0_41 = arith.constant 0 : index
    %c256_42 = arith.constant 256 : index
    %64 = vector.load %arg9[%c0_41, %c256_42] : memref<1x512xf32, #tpu.memory_space<vmem>>, vector<1x256xf32>
    tpu.vector_store %arg9[%c0_41, %c256_42], %63 {strides = array<i32>} : memref<1x512xf32, #tpu.memory_space<vmem>>, vector<1x256xf32>,
    return
  }
  func.func @transform_0(%arg0: i32) -> (i32, i32) {
    %c0_i32 = arith.constant 0 : i32
    %c0_i32_0 = arith.constant 0 : i32
    return %arg0, %c0_i32 : i32, i32
  }
  func.func @transform_1(%arg0: i32) -> (i32, i32) {
    %c0_i32 = arith.constant 0 : i32
    %c0_i32_0 = arith.constant 0 : i32
    %c0_i32_1 = arith.constant 0 : i32
    return %c0_i32, %c0_i32_0 : i32, i32
  }
  func.func @transform_2(%arg0: i32) -> (i32, i32) {
    %c0_i32 = arith.constant 0 : i32
    %c0_i32_0 = arith.constant 0 : i32
    %c0_i32_1 = arith.constant 0 : i32
    return %c0_i32, %c0_i32_0 : i32, i32
  }
  func.func @transform_3(%arg0: i32) -> (i32, i32) {
    %c0_i32 = arith.constant 0 : i32
    %c0_i32_0 = arith.constant 0 : i32
    %c0_i32_1 = arith.constant 0 : i32
    return %c0_i32, %c0_i32_0 : i32, i32
  }
  func.func @transform_4(%arg0: i32) -> (i32, i32) {
    %c0_i32 = arith.constant 0 : i32
    %c0_i32_0 = arith.constant 0 : i32
    %c0_i32_1 = arith.constant 0 : i32
    return %c0_i32, %c0_i32_0 : i32, i32
  }
  func.func @transform_5(%arg0: i32) -> (i32, i32) {
    %c0_i32 = arith.constant 0 : i32
    %c0_i32_0 = arith.constant 0 : i32
    %c0_i32_1 = arith.constant 0 : i32
    return %c0_i32, %c0_i32_0 : i32, i32
  }
  func.func @transform_6(%arg0: i32) -> (i32, i32) {
    %c0_i32 = arith.constant 0 : i32
    %c0_i32_0 = arith.constant 0 : i32
    %c0_i32_1 = arith.constant 0 : i32
    return %c0_i32, %c0_i32_0 : i32, i32
  }
  func.func @transform_7(%arg0: i32) -> (i32, i32) {
    %c0_i32 = arith.constant 0 : i32
    %c0_i32_0 = arith.constant 0 : i32
    %c0_i32_1 = arith.constant 0 : i32
    return %c0_i32, %c0_i32_0 : i32, i32
  }
  func.func @transform_8(%arg0: i32) -> (i32, i32) {
    %c0_i32 = arith.constant 0 : i32
    %c0_i32_0 = arith.constant 0 : i32
    return %c0_i32, %arg0 : i32, i32
  }
}

</mosaic_0001>

<bundles_post_ra>
// kernel: critic_forward.1
= control target key start
LH: loop header
LB: loop body
LE: loop exit
PB: predicated region body
PF: predicated region fallthrough
CT: control target
= control target key end

     0   :  { %v3152_v2 = vmov 0   ;;  %s3153_s24 = smov 96   ;;  %vm117_vm0 = vcmask 261120   ;;  %vm585_vm1 = vcmask 1043456   ;;  %s4479_s0 = inlined_call_operand.vmem [shape: f32[512,40], index: 0, kind: input, shape index: {}]   ;;  %s4480_s1 = inlined_call_operand.vmem [shape: bf16[32,256], index: 1, kind: input, shape index: {}]   ;;  %s4481_s2 = inlined_call_operand.vmem [shape: f32[1,256], index: 2, kind: input, shape index: {}]   ;;  %s4482_s3 = inlined_call_operand.vmem [shape: bf16[256,128], index: 3, kind: input, shape index: {}]   ;;  %s4483_s4 = inlined_call_operand.vmem [shape: bf16[8,128], index: 4, kind: input, shape index: {}]   ;;  %s4484_s5 = inlined_call_operand.vmem [shape: f32[1,128], index: 5, kind: input, shape index: {}]   ;;  %s4485_s6 = inlined_call_operand.vmem [shape: f32[128,1], index: 6, kind: input, shape index: {}]   ;;  %s4486_s7 = inlined_call_operand.<no memory space> [shape: f32[1,1], index: 7, kind: input, shape index: {}]   ;;  %s4487_s8 = inlined_call_operand.hbm [shape: f32[1,512], index: 8, kind: output, shape index: {}]  }
   0x1   :  { %v3089_v0 = vld [vmem:[%s4480_s1 + $0x4] ss:$8 sps:$4 sm:$0xff]   ;;  %v3091_v1 = vld [vmem:[%s4480_s1] ss:$8 sps:$4 sm:$0xff]   ;;  %198 = vmatprep.mubr.bf16.mxu0 %v3152_v2  ;;  %3088 = vset.pattern.permute.xlu1 %v3152_v2  ;;  %v3092_v3 = vld [vmem:[%s4480_s1 + $0x14] ss:$8 sps:$4 sm:$0xff]  }
   0x2   :  { %166 = vmatprep.subr.bf16.mxu0 %v3089_v0  ;;  %v33_v4 = vld [vmem:[%s4479_s0] sm:$0xff]  ;;  %3087 = vset.pattern.permute.xlu0 %v3152_v2  ;;  %v3094_v5 = vld [vmem:[%s4480_s1 + $0x10] ss:$8 sps:$4 sm:$0xff]   ;;  %v34_v6 = vld [vmem:[%s4479_s0 + $0x8] sm:$0xff] }
   0x3   :  { %167 = vmatpush1.bf16.msra.mxu0 %v3091_v1  ;;  %v65_v7 = vpack.c.bf16 %v34_v6, %v33_v4  ;;  %v37_v8 = vld [vmem:[%s4479_s0 + $0x20] sm:$0xff]  ;;  %v38_v9 = vld [vmem:[%s4479_s0 + $0x28] sm:$0xff]  ;;  %v35_v10 = vld [vmem:[%s4479_s0 + $0x10] sm:$0xff] }
   0x4   :  { %168 = vmatprep.subr.bf16.mxu0 %v3092_v3  ;;  %v36_v11 = vld [vmem:[%s4479_s0 + $0x18] sm:$0xff]  ;;  %v67_v12 = vpack.c.bf16 %v38_v9, %v37_v8  ;;  %v39_v13 = vld [vmem:[%s4479_s0 + $0x30] sm:$0xff]  ;;  %v41_v16 = vld [vmem:[%s4479_s0 + $0x40] sm:$0xff] }
   0x5   :  { %504 = vrot.lane.b32.xlu0 %v65_v7, %s3153_s24  ;;  %v40_v14 = vld [vmem:[%s4479_s0 + $0x38] sm:$0xff]  ;;  %v66_v15 = vpack.c.bf16 %v36_v11, %v35_v10  ;;  %v42_v17 = vld [vmem:[%s4479_s0 + $0x48] sm:$0xff]  ;;  %v43_v19 = vld [vmem:[%s4479_s0 + $0x50] sm:$0xff] }
   0x6   :  { %508 = vrot.lane.b32.xlu1 %v67_v12, %s3153_s24  ;;  %v68_v18 = vpack.c.bf16 %v40_v14, %v39_v13  ;;  %v44_v20 = vld [vmem:[%s4479_s0 + $0x58] sm:$0xff]  ;;  %v3257_v21 = vpack.c.bf16 %v42_v17, %v41_v16  ;;  %v45_v22 = vld [vmem:[%s4479_s0 + $0x60] sm:$0xff]  ;;  %v46_v23 = vld [vmem:[%s4479_s0 + $0x68] sm:$0xff] }
   0x7   :  { %169 = vmatpush1.bf16.msra.mxu0 %v3094_v5  ;;  %v3266_v24 = vpack.c.bf16 %v44_v20, %v43_v19  ;;  %v47_v25 = vld [vmem:[%s4479_s0 + $0x70] sm:$0xff]  ;;  %v48_v26 = vld [vmem:[%s4479_s0 + $0x78] sm:$0xff]  ;;  %v49_v27 = vld [vmem:[%s4479_s0 + $0x80] sm:$0xff]  ;;  %v3288_v31 = vpack.c.bf16 %v46_v23, %v45_v22 }
   0x8   :  { %1470 = vmatprep.subr.bf16.mxu0 %v3089_v0  ;;  %v50_v28 = vld [vmem:[%s4479_s0 + $0x88] sm:$0xff]  ;;  %v51_v29 = vld [vmem:[%s4479_s0 + $0x90] sm:$0xff]  ;;  %v52_v30 = vld [vmem:[%s4479_s0 + $0x98] sm:$0xff]  ;;  %v3299_v34 = vpack.c.bf16 %v48_v26, %v47_v25 }
   0x9   :  { %506 = vrot.lane.b32.xlu0 %v66_v15, %s3153_s24  ;;  %v53_v32 = vld [vmem:[%s4479_s0 + $0xa0] sm:$0xff]  ;;  %v54_v33 = vld [vmem:[%s4479_s0 + $0xa8] sm:$0xff]  ;;  %v55_v35 = vld [vmem:[%s4479_s0 + $0xb0] sm:$0xff]  ;;  %v3310_v37 = vpack.c.bf16 %v50_v28, %v49_v27  ;;  %v3314_v38 = vpack.c.bf16 %v52_v30, %v51_v29 }
   0xa   :  { %2653 = vmatmul.mubr.msk.bf16.vlgmr.msra.gmra.mrb[0].mxu0 %vm117_vm0, %v65_v7  ;;  %510 = vrot.lane.b32.xlu1 %v68_v18, %s3153_s24  ;;  %v56_v36 = vld [vmem:[%s4479_s0 + $0xb8] sm:$0xff]  ;;  %v57_v39 = vld [vmem:[%s4479_s0 + $0xc0] sm:$0xff]  ;;  %v58_v40 = vld [vmem:[%s4479_s0 + $0xc8] sm:$0xff]  ;;  %v3324_v41 = vpack.c.bf16 %v54_v33, %v53_v32 }
   0xb   :  { %1471 = vmatpush1.bf16.msra.mxu0 %v3091_v1  ;;  %208 = vmatprep.mubr.bf16.mxu0 %v3152_v2  ;;  %v59_v42 = vld [vmem:[%s4479_s0 + $0xd0] sm:$0xff]  ;;  %v60_v43 = vld [vmem:[%s4479_s0 + $0xd8] sm:$0xff]  ;;  %v3334_v44 = vpack.c.bf16 %v56_v36, %v55_v35  ;;  %v61_v45 = vld [vmem:[%s4479_s0 + $0xe0] sm:$0xff]  ;;  %v3345_v47 = vpack.c.bf16 %v58_v40, %v57_v39 }
   0xc   :  { %1472 = vmatprep.subr.bf16.mxu0 %v3092_v3  ;;  %v62_v46 = vld [vmem:[%s4479_s0 + $0xe8] sm:$0xff]  ;;  %v63_v48 = vld [vmem:[%s4479_s0 + $0xf0] sm:$0xff]  ;;  %v64_v49 = vld [vmem:[%s4479_s0 + $0xf8] sm:$0xff]  ;;  %v3359_v51 = vpack.c.bf16 %v60_v43, %v59_v42 }
   0xd   :  { %512 = vrot.lane.b32.xlu0 %v3257_v21, %s3153_s24  ;;  %v487_v50 = vld [vmem:[%s4483_s4] sm:$0xf]  ;;  %v3364_v52 = vpack.c.bf16 %v62_v46, %v61_v45  ;;  %v1339_v54 = vld [vmem:[%s4479_s0 + $0x108] sm:$0xff]  ;;  %v3374_v55 = vpack.c.bf16 %v64_v49, %v63_v48  ;;  %v1340_v56 = vld [vmem:[%s4479_s0 + $0x110] sm:$0xff] }
   0xe   :  { %514 = vrot.lane.b32.xlu1 %v3266_v24, %s3153_s24  ;;  %3081 = vmatprep.subr.msk.bf16.mxu1 %vm585_vm1, %v487_v50  ;;  %v1338_v53 = vld [vmem:[%s4479_s0 + $0x100] sm:$0xff]  ;;  %v587_v57 = vsel %vm585_vm1, %v487_v50, 0  ;;  %v1341_v58 = vld [vmem:[%s4479_s0 + $0x118] sm:$0xff]  ;;  %v1343_v61 = vld [vmem:[%s4479_s0 + $0x128] sm:$0xff] }
   0xf   :  { %1473 = vmatpush1.bf16.msra.mxu0 %v3094_v5  ;;  %v3095_v59 = vld [vmem:[%s4482_s3 + $0x40] sm:$0xff]   ;;  %3014 = vmatpush3.bf16.msra.mxu1 %v587_v57  ;;  %v3398_v62 = vpack.c.bf16 %v1339_v54, %v1338_v53  ;;  %v1344_v63 = vld [vmem:[%s4479_s0 + $0x130] sm:$0xff]  ;;  %v3403_v0 = vpack.c.bf16 %v1341_v58, %v1340_v56  ;;  %v1345_v1 = vld [vmem:[%s4479_s0 + $0x138] sm:$0xff] }
  0x10   :  { %v1342_v60 = vld [vmem:[%s4479_s0 + $0x120] sm:$0xff]  ;;  %2772 = vmatprep.subr.bf16.mxu1 %v3095_v59 }
  0x11   :  { %516 = vrot.lane.b32.xlu0 %v3288_v31, %s3153_s24 }
  0x12   :  { %2654 = vmatmul.mubr.msk.bf16.gmra.mrb[4].mxu0 %vm117_vm0, %v66_v15  ;;  %518 = vrot.lane.b32.xlu1 %v3299_v34, %s3153_s24 }
  0x13   :  { %218 = vmatprep.mubr.bf16.mxu0 %v3152_v2 }
  0x15   :  { %520 = vrot.lane.b32.xlu0 %v3310_v37, %s3153_s24 }
  0x16   :  { %522 = vrot.lane.b32.xlu1 %v3314_v38, %s3153_s24 }
  0x19   :  { %524 = vrot.lane.b32.xlu0 %v3324_v41, %s3153_s24 }
  0x1a   :  { %2655 = vmatmul.mubr.msk.bf16.gmra.mrb[8].mxu0 %vm117_vm0, %v67_v12  ;;  %526 = vrot.lane.b32.xlu1 %v3334_v44, %s3153_s24 }
  0x1b   :  { %228 = vmatprep.mubr.bf16.mxu0 %v3152_v2 }
  0x1d   :  { %528 = vrot.lane.b32.xlu0 %v3345_v47, %s3153_s24 }
  0x1e   :  { %530 = vrot.lane.b32.xlu1 %v3359_v51, %s3153_s24 }
  0x21   :  { %532 = vrot.lane.b32.xlu0 %v3364_v52, %s3153_s24 }
  0x22   :  { %2656 = vmatmul.mubr.msk.bf16.gmra.mrb[12].mxu0 %vm117_vm0, %v68_v18  ;;  %534 = vrot.lane.b32.xlu1 %v3374_v55, %s3153_s24 }
  0x23   :  { %238 = vmatprep.mubr.bf16.mxu0 %v3152_v2 }
  0x25   :  { %1808 = vrot.lane.b32.xlu0 %v3398_v62, %s3153_s24 }
  0x26   :  { %14 = vsyncpa [#allocation4], 0  ;;  %v3410_v3 = vpack.c.bf16 %v1343_v61, %v1342_v60  ;;  %1810 = vrot.lane.b32.xlu1 %v3403_v0, %s3153_s24  ;;  %v1346_v4 = vld [vmem:[%s4479_s0 + $0x140] sm:$0xff]  ;;  %v1347_v5 = vld [vmem:[%s4479_s0 + $0x148] sm:$0xff]  ;;  %v3422_v6 = vpack.c.bf16 %v1345_v1, %v1344_v63  ;;  %vm536_vm2 = vcmask 64512  }
  0x27   :  { %v1348_v7 = vld [vmem:[%s4479_s0 + $0x150] sm:$0xff]  ;;  %v1349_v8 = vld [vmem:[%s4479_s0 + $0x158] sm:$0xff]  ;;  %v3433_v9 = vpack.c.bf16 %v1347_v5, %v1346_v4  ;;  %v1350_v11 = vld [vmem:[%s4479_s0 + $0x160] sm:$0xff] }
  0x28   :  { %v3437_v10 = vpack.c.bf16 %v1349_v8, %v1348_v7  ;;  %v1351_v12 = vld [vmem:[%s4479_s0 + $0x168] sm:$0xff]  ;;  %v1352_v14 = vld [vmem:[%s4479_s0 + $0x170] sm:$0xff]  ;;  %v1353_v15 = vld [vmem:[%s4479_s0 + $0x178] sm:$0xff] }
  0x29   :  { %1812 = vrot.lane.b32.xlu0 %v3410_v3, %s3153_s24  ;;  %v3452_v13 = vpack.c.bf16 %v1351_v12, %v1350_v11  ;;  %v3465_v16 = vpack.c.bf16 %v1353_v15, %v1352_v14  ;;  %v1354_v17 = vld [vmem:[%s4479_s0 + $0x180] sm:$0xff]  ;;  %v1355_v18 = vld [vmem:[%s4479_s0 + $0x188] sm:$0xff]  ;;  %v1356_v20 = vld [vmem:[%s4479_s0 + $0x190] sm:$0xff] }
  0x2a   :  { %2657 = vmatmul.mubr.msk.bf16.gmra.mrb[16].mxu0 %vm117_vm0, %v3257_v21  ;;  %1814 = vrot.lane.b32.xlu1 %v3422_v6, %s3153_s24  ;;  %v3478_v19 = vpack.c.bf16 %v1355_v18, %v1354_v17  ;;  %v1357_v21 = vld [vmem:[%s4479_s0 + $0x198] sm:$0xff]  ;;  %v1358_v23 = vld [vmem:[%s4479_s0 + $0x1a0] sm:$0xff]  ;;  %v1360_v26 = vld [vmem:[%s4479_s0 + $0x1b0] sm:$0xff] }
  0x2b   :  { %248 = vmatprep.mubr.bf16.mxu0 %v3152_v2  ;;  %v3491_v22 = vpack.c.bf16 %v1357_v21, %v1356_v20  ;;  %v1361_v27 = vld [vmem:[%s4479_s0 + $0x1b8] sm:$0xff]  ;;  %v1362_v29 = vld [vmem:[%s4479_s0 + $0x1c0] sm:$0xff]  ;;  %v1363_v30 = vld [vmem:[%s4479_s0 + $0x1c8] sm:$0xff] }
  0x2c   :  { %v3517_v28 = vpack.c.bf16 %v1361_v27, %v1360_v26  ;;  %v1364_v32 = vld [vmem:[%s4479_s0 + $0x1d0] sm:$0xff]  ;;  %v1365_v33 = vld [vmem:[%s4479_s0 + $0x1d8] sm:$0xff]  ;;  %v1366_v35 = vld [vmem:[%s4479_s0 + $0x1e0] sm:$0xff] }
  0x2d   :  { %1816 = vrot.lane.b32.xlu0 %v3433_v9, %s3153_s24  ;;  %v1367_v36 = vld [vmem:[%s4479_s0 + $0x1e8] sm:$0xff]  ;;  %v3096_v39 = vld [vmem:[%s4482_s3] sm:$0xff]   ;;  %v1368_v45 = vld [vmem:[%s4479_s0 + $0x1f0] sm:$0xff] }
  0x2e   :  { %1818 = vrot.lane.b32.xlu1 %v3437_v10, %s3153_s24  ;;  %v3097_v40 = vld [vmem:[%s4482_s3 + $0x48] sm:$0xff]   ;;  %v1369_v46 = vld [vmem:[%s4479_s0 + $0x1f8] sm:$0xff]  ;;  %v3100_v48 = vld [vmem:[%s4482_s3 + $0x10] sm:$0xff]  }
  0x2f   :  { %v3098_v43 = vld [vmem:[%s4482_s3 + $0x8] sm:$0xff]   ;;  %v3589_v49 = vpack.c.bf16 %v1369_v46, %v1368_v45  ;;  %v3102_v53 = vld [vmem:[%s4482_s3 + $0x18] sm:$0xff]   ;;  %v3103_v54 = vld [vmem:[%s4482_s3 + $0x60] sm:$0xff]  }
  0x30   :  { %v3104_v57 = vld [vmem:[%s4482_s3 + $0x20] sm:$0xff]   ;;  %v3105_v59 = vld [vmem:[%s4482_s3 + $0x68] sm:$0xff]   ;;  %v3107_v61 = vld [vmem:[%s4482_s3 + $0x70] sm:$0xff]  }
  0x31   :  { %1820 = vrot.lane.b32.xlu0 %v3452_v13, %s3153_s24  ;;  %v3106_v60 = vld [vmem:[%s4482_s3 + $0x28] sm:$0xff]   ;;  %v3108_v63 = vld [vmem:[%s4482_s3 + $0x30] sm:$0xff]   ;;  %v3109_v4 = vld [vmem:[%s4482_s3 + $0x78] sm:$0xff]  }
  0x32   :  { %2658 = vmatmul.mubr.msk.bf16.gmra.mrb[20].mxu0 %vm117_vm0, %v3266_v24  ;;  %1822 = vrot.lane.b32.xlu1 %v3465_v16, %s3153_s24  ;;  %v1359_v24 = vld [vmem:[%s4479_s0 + $0x1a8] sm:$0xff]  ;;  %v3111_v5 = vld [vmem:[%s4482_s3 + $0x40] sm:$0xff]  }
  0x33   :  { %258 = vmatprep.mubr.bf16.mxu0 %v3152_v2  ;;  %v3504_v25 = vpack.c.bf16 %v1359_v24, %v1358_v23  ;;  %v85_v15 = vld [vmem:[%s4481_s2] sm:$0x3]  ;;  %v3114_v46 = vld [vmem:[%s4482_s3 + $0x8] sm:$0xff]  }
  0x35   :  { %1824 = vrot.lane.b32.xlu0 %v3478_v19, %s3153_s24 }
  0x36   :  { %1826 = vrot.lane.b32.xlu1 %v3491_v22, %s3153_s24 }
  0x39   :  { %1828 = vrot.lane.b32.xlu0 %v3504_v25, %s3153_s24 }
  0x3a   :  { %2659 = vmatmul.mubr.msk.bf16.gmra.mrb[24].mxu0 %vm117_vm0, %v3288_v31  ;;  %1830 = vrot.lane.b32.xlu1 %v3517_v28, %s3153_s24  ;;  %v3530_v31 = vpack.c.bf16 %v1363_v30, %v1362_v29 }
  0x3b   :  { %268 = vmatprep.mubr.bf16.mxu0 %v3152_v2 }
  0x3d   :  { %1832 = vrot.lane.b32.xlu0 %v3530_v31, %s3153_s24 }
  0x42   :  { %2660 = vmatmul.mubr.msk.bf16.gmra.mrb[28].mxu0 %vm117_vm0, %v3299_v34  ;;  %v3543_v34 = vpack.c.bf16 %v1365_v33, %v1364_v32 }
  0x43   :  { %278 = vmatprep.mubr.bf16.mxu0 %v3152_v2 }
  0x44   :  { %1834 = vrot.lane.b32.xlu1 %v3543_v34, %s3153_s24 }
  0x48   :  { %1838 = vrot.lane.b32.xlu1 %v3589_v49, %s3153_s24 }
  0x4a   :  { %2661 = vmatmul.mubr.msk.bf16.gmra.mrb[32].mxu0 %vm117_vm0, %v3310_v37 }
  0x4b   :  { %288 = vmatprep.mubr.bf16.mxu0 %v3152_v2 }
  0x52   :  { %2662 = vmatmul.mubr.msk.bf16.gmra.mrb[36].mxu0 %vm117_vm0, %v3314_v38  ;;  %v3556_v38 = vpack.c.bf16 %v1367_v36, %v1366_v35 }
  0x53   :  { %298 = vmatprep.mubr.bf16.mxu0 %v3152_v2 }
  0x54   :  { %1836 = vrot.lane.b32.xlu0 %v3556_v38, %s3153_s24 }
  0x5a   :  { %2663 = vmatmul.mubr.msk.bf16.gmra.mrb[40].mxu0 %vm117_vm0, %v3324_v41 }
  0x5b   :  { %308 = vmatprep.mubr.bf16.mxu0 %v3152_v2 }
  0x62   :  { %2664 = vmatmul.mubr.msk.bf16.gmra.mrb[44].mxu0 %vm117_vm0, %v3334_v44  ;;  %v3099_v44 = vld [vmem:[%s4482_s3 + $0x50] sm:$0xff]  }
  0x63   :  { %318 = vmatprep.mubr.bf16.mxu0 %v3152_v2 }
  0x6a   :  { %2665 = vmatmul.mubr.msk.bf16.gmra.mrb[48].mxu0 %vm117_vm0, %v3345_v47 }
  0x6b   :  { %328 = vmatprep.mubr.bf16.mxu0 %v3152_v2 }
  0x72   :  { %2666 = vmatmul.mubr.msk.bf16.gmra.mrb[52].mxu0 %vm117_vm0, %v3359_v51  ;;  %v3101_v51 = vld [vmem:[%s4482_s3 + $0x58] sm:$0xff]  }
  0x73   :  { %338 = vmatprep.mubr.bf16.mxu0 %v3152_v2 }
  0x77   :  { %v505_v37 = vpop.permute.xlu0 %504 }
  0x78   :  { %3015 = vmatprep.mubr.msk.bf16.mxu1 %vm536_vm2, %v505_v37  ;;  %v509_v42 = vpop.permute.xlu1 %508  ;;  %v3112_v37 = vld [vmem:[%s4482_s3] sm:$0xff]  }
  0x7a   :  { %2667 = vmatmul.mubr.msk.bf16.gmra.mrb[56].mxu0 %vm117_vm0, %v3364_v52  ;;  %v1791_v52 = vld [vmem:[%s4483_s4] sm:$0xf] }
  0x7b   :  { %348 = vmatprep.mubr.bf16.mxu0 %v3152_v2  ;;  %v507_v41 = vpop.permute.xlu0 %506  ;;  %3082 = vmatprep.subr.msk.bf16.mxu0 %vm585_vm1, %v1791_v52 }
  0x7c   :  { %3016 = vmatmul.mubr.msk.bf16.vlgmr.msra.gmra.mrb[0].mxu1 %vm536_vm2, %v507_v41  ;;  %v511_v47 = vpop.permute.xlu1 %510  ;;  %v3113_v41 = vld [vmem:[%s4482_s3 + $0x48] sm:$0xff]  }
  0x7d   :  { %2773 = vmatpush3.bf16.msra.mxu1 %v3096_v39  ;;  %3019 = vmatprep.mubr.msk.bf16.mxu1 %vm536_vm2, %v509_v42 }
  0x7e   :  { %2774 = vmatprep.subr.bf16.mxu1 %v3097_v40 }
  0x7f   :  { %v513_v50 = vpop.permute.xlu0 %512 }
  0x80   :  { %v515_v56 = vpop.permute.xlu1 %514 }
  0x81   :  { %2775 = vmatpush3.bf16.msra.mxu1 %v3098_v43 }
  0x82   :  { %2668 = vmatmul.mubr.msk.bf16.gmra.mrb[60].mxu0 %vm117_vm0, %v3374_v55  ;;  %2776 = vmatprep.subr.bf16.mxu1 %v3099_v44  ;;  %v1889_v55 = vsel %vm585_vm1, %v1791_v52, 0 }
  0x83   :  { %1502 = vmatprep.mubr.bf16.mxu0 %v3152_v2  ;;  %v517_v58 = vpop.permute.xlu0 %516 }
  0x84   :  { %3020 = vmatmul.mubr.msk.bf16.gmra.mrb[4].mxu1 %vm536_vm2, %v511_v47 }
  0x85   :  { %3023 = vmatprep.mubr.msk.bf16.mxu1 %vm536_vm2, %v513_v50  ;;  %2777 = vmatpush3.bf16.msra.mxu1 %v3100_v48  ;;  %v3115_v50 = vld [vmem:[%s4482_s3 + $0x50] sm:$0xff]  }
  0x86   :  { %2778 = vmatprep.subr.bf16.mxu1 %v3101_v51 }
  0x87   :  { %v521_v1 = vpop.permute.xlu0 %520 }
  0x89   :  { %2779 = vmatpush3.bf16.msra.mxu1 %v3102_v53  ;;  %v3723_v53 = vld [vmem:[%s4485_s6 + $0x8] sm:$0xff] }
  0x8a   :  { %2706 = vmatmul.mubr.msk.bf16.vlgmr.msra.gmra.mrb[64].mxu0 %vm117_vm0, %v3398_v62  ;;  %2780 = vmatprep.subr.bf16.mxu1 %v3103_v54  ;;  %v519_v62 = vpop.permute.xlu1 %518 }
  0x8b   :  { %1512 = vmatprep.mubr.bf16.mxu0 %v3152_v2  ;;  %3048 = vmatpush3.bf16.msra.mxu0 %v1889_v55  ;;  %v525_v8 = vpop.permute.xlu0 %524 }
  0x8c   :  { %3024 = vmatmul.mubr.msk.bf16.gmra.mrb[8].mxu1 %vm536_vm2, %v515_v56  ;;  %1165 = vperm.xlu1 %3088, %v3723_v53  }
  0x8d   :  { %3027 = vmatprep.mubr.msk.bf16.mxu1 %vm536_vm2, %v517_v58  ;;  %2781 = vmatpush3.bf16.msra.mxu1 %v3104_v57 }
  0x8e   :  { %2782 = vmatprep.subr.bf16.mxu1 %v3105_v59  ;;  %v523_v7 = vpop.permute.xlu1 %522  ;;  %v3117_v59 = vld [vmem:[%s4482_s3 + $0x58] sm:$0xff]  }
  0x8f   :  { %v529_v12 = vpop.permute.xlu0 %528 }
  0x91   :  { %2783 = vmatpush3.bf16.msra.mxu1 %v3106_v60 }
  0x92   :  { %2707 = vmatmul.mubr.msk.bf16.gmra.mrb[68].mxu0 %vm117_vm0, %v3403_v0  ;;  %2784 = vmatprep.subr.bf16.mxu1 %v3107_v61  ;;  %v3110_v0 = vld [vmem:[%s4482_s3 + $0x38] sm:$0xff]   ;;  %v527_v11 = vpop.permute.xlu1 %526 }
  0x93   :  { %1522 = vmatprep.mubr.bf16.mxu0 %v3152_v2  ;;  %v533_v14 = vpop.permute.xlu0 %532 }
  0x94   :  { %3028 = vmatmul.mubr.msk.bf16.gmra.mrb[12].mxu1 %vm536_vm2, %v519_v62  ;;  %v3737_v62 = vld [vmem:[%s4485_s6 + $0x18] sm:$0xff] }
  0x95   :  { %3031 = vmatprep.mubr.msk.bf16.mxu1 %vm536_vm2, %v521_v1  ;;  %2785 = vmatpush3.bf16.msra.mxu1 %v3108_v63 }
  0x96   :  { %2786 = vmatprep.subr.bf16.mxu1 %v3109_v4  ;;  %1175 = vperm.xlu1 %3088, %v3737_v62  }
  0x99   :  { %2787 = vmatpush3.bf16.msra.mxu1 %v3110_v0  ;;  %v3118_v0 = vld [vmem:[%s4482_s3 + $0x18] sm:$0xff]  }
  0x9a   :  { %2708 = vmatmul.mubr.msk.bf16.gmra.mrb[72].mxu0 %vm117_vm0, %v3410_v3  ;;  %2901 = vmatprep.subr.bf16.mxu1 %v3111_v5  ;;  %v531_v3 = vpop.permute.xlu1 %530 }
  0x9b   :  { %1532 = vmatprep.mubr.bf16.mxu0 %v3152_v2 }
  0x9c   :  { %3032 = vmatmul.mubr.msk.bf16.gmra.mrb[16].mxu1 %vm536_vm2, %v523_v7 }
  0x9d   :  { %3035 = vmatprep.mubr.msk.bf16.mxu1 %vm536_vm2, %v525_v8  ;;  %v3119_v8 = vld [vmem:[%s4482_s3 + $0x60] sm:$0xff]  }
  0xa2   :  { %2709 = vmatmul.mubr.msk.bf16.gmra.mrb[76].mxu0 %vm117_vm0, %v3422_v6  ;;  %v535_v6 = vpop.permute.xlu1 %534 }
  0xa3   :  { %1542 = vmatprep.mubr.bf16.mxu0 %v3152_v2 }
  0xa4   :  { %3036 = vmatmul.mubr.msk.bf16.gmra.mrb[20].mxu1 %vm536_vm2, %v527_v11 }
  0xa5   :  { %3039 = vmatprep.mubr.msk.bf16.mxu1 %vm536_vm2, %v529_v12 }
  0xaa   :  { %2710 = vmatmul.mubr.msk.bf16.gmra.mrb[80].mxu0 %vm117_vm0, %v3433_v9  ;;  %v4488_v9 = vlaneseq }
  0xab   :  { %1552 = vmatprep.mubr.bf16.mxu0 %v3152_v2 }
  0xac   :  { %3040 = vmatmul.mubr.msk.bf16.gmra.mrb[24].mxu1 %vm536_vm2, %v531_v3  ;;  %v3754_v3 = vld [vmem:[%s4485_s6 + $0x28] sm:$0xff] }
  0xad   :  { %3043 = vmatprep.mubr.msk.bf16.mxu1 %vm536_vm2, %v533_v14  ;;  %1185 = vperm.xlu1 %3088, %v3754_v3  }
  0xb2   :  { %2711 = vmatmul.mubr.msk.bf16.gmra.mrb[84].mxu0 %vm117_vm0, %v3437_v10  ;;  %v3675_v10 = vshrl.u32 %v4488_v9, 7 }
  0xb3   :  { %1562 = vmatprep.mubr.bf16.mxu0 %v3152_v2 }
  0xb4   :  { %3044 = vmatmul.mubr.msk.bf16.gmra.mrb[28].mxu1 %vm536_vm2, %v535_v6  ;;  %4500 = vst [vmem:[#allocation6_spill] sm:$0xff] %v3675_v10 }
  0xba   :  { %2712 = vmatmul.mubr.msk.bf16.gmra.mrb[88].mxu0 %vm117_vm0, %v3452_v13  ;;  %v89_v13 = vsub.s32 0, %v3675_v10 }
  0xbb   :  { %1572 = vmatprep.mubr.bf16.mxu0 %v3152_v2 }
  0xbc   :  { %v3687_v17 = vrot.slane %v85_v15, %v89_v13 }
  0xc2   :  { %2713 = vmatmul.mubr.msk.bf16.gmra.mrb[92].mxu0 %vm117_vm0, %v3465_v16  ;;  %v93_v16 = vsub.s32 1, %v3675_v10 }
  0xc3   :  { %1582 = vmatprep.mubr.bf16.mxu0 %v3152_v2 }
  0xc4   :  { %v3691_v18 = vrot.slane %v85_v15, %v93_v16 }
  0xca   :  { %2714 = vmatmul.mubr.msk.bf16.gmra.mrb[96].mxu0 %vm117_vm0, %v3478_v19 }
  0xcb   :  { %1592 = vmatprep.mubr.bf16.mxu0 %v3152_v2 }
  0xd2   :  { %2715 = vmatmul.mubr.msk.bf16.gmra.mrb[100].mxu0 %vm117_vm0, %v3491_v22 }
  0xd3   :  { %1602 = vmatprep.mubr.bf16.mxu0 %v3152_v2 }
  0xda   :  { %2716 = vmatmul.mubr.msk.bf16.gmra.mrb[104].mxu0 %vm117_vm0, %v3504_v25 }
  0xdb   :  { %1612 = vmatprep.mubr.bf16.mxu0 %v3152_v2 }
  0xdd   :  { %v200_v19 = vpop.f32.mrb[0].mxu0 }
  0xde   :  { %v201_v20 = vadd.f32 %v200_v19, %v3687_v17  ;;  %v202_v21 = vpop.f32.mrb[1].mxu0 }
  0xdf   :  { %v203_v22 = vadd.f32 %v202_v21, %v3691_v18  ;;  %v204_v23 = vpop.f32.mrb[2].mxu0  ;;  %v3121_v21 = vld [vmem:[%s4482_s3 + $0x68] sm:$0xff]  }
  0xe0   :  { %v205_v24 = vadd.f32 %v204_v23, %v3687_v17  ;;  %v206_v25 = vpop.f32.mrb[3].mxu0  ;;  %v359_v27 = vmax.f32 %v201_v20, 0.0 }
  0xe1   :  { %v207_v26 = vadd.f32 %v206_v25, %v3691_v18  ;;  %v360_v30 = vmax.f32 %v203_v22, 0.0 }
  0xe2   :  { %v361_v29 = vmax.f32 %v205_v24, 0.0  ;;  %2717 = vmatmul.mubr.msk.bf16.gmra.mrb[108].mxu0 %vm117_vm0, %v3517_v28  ;;  %v3768_v24 = vld [vmem:[%s4485_s6 + $0x38] sm:$0xff] }
  0xe3   :  { %v362_v32 = vmax.f32 %v207_v26, 0.0  ;;  %1622 = vmatprep.mubr.bf16.mxu0 %v3152_v2  ;;  %1195 = vperm.xlu1 %3088, %v3768_v24  }
  0xe4   :  { %v423_v33 = vpack.c.bf16 %v361_v29, %v359_v27  ;;  %v3122_v29 = vld [vmem:[%s4482_s3 + $0x28] sm:$0xff]  }
  0xe5   :  { %v424_v35 = vpack.c.bf16 %v362_v32, %v360_v30  ;;  %v210_v36 = vpop.f32.mrb[4].mxu0 }
  0xe6   :  { %v211_v39 = vadd.f32 %v210_v36, %v3687_v17  ;;  %v212_v40 = vpop.f32.mrb[5].mxu0 }
  0xe7   :  { %v213_v28 = vadd.f32 %v212_v40, %v3691_v18  ;;  %v214_v42 = vpop.f32.mrb[6].mxu0  ;;  %878 = vmatprep.mubr.bf16.mxu1 %v424_v35 }
  0xe8   :  { %v215_v43 = vadd.f32 %v214_v42, %v3687_v17  ;;  %v216_v44 = vpop.f32.mrb[7].mxu0  ;;  %879 = vmatmul.mubr.bf16.vlgmr.msra.gmra.mrb[32].mxu1 %v423_v33  ;;  %v363_v47 = vmax.f32 %v211_v39, 0.0  ;;  %v3123_v33 = vld [vmem:[%s4482_s3 + $0x70] sm:$0xff]  }
  0xe9   :  { %v217_v45 = vadd.f32 %v216_v44, %v3691_v18  ;;  %2902 = vmatpush3.bf16.msra.mxu1 %v3112_v37  ;;  %v364_v51 = vmax.f32 %v213_v28, 0.0  ;;  %v3785_v37 = vld [vmem:[%s4485_s6 + $0x48] sm:$0xff] }
  0xea   :  { %v365_v48 = vmax.f32 %v215_v43, 0.0  ;;  %2718 = vmatmul.mubr.msk.bf16.gmra.mrb[112].mxu0 %vm117_vm0, %v3530_v31  ;;  %2903 = vmatprep.subr.bf16.mxu1 %v3113_v41  ;;  %v3116_v31 = vld [vmem:[%s4482_s3 + $0x10] sm:$0xff]  }
  0xeb   :  { %v366_v52 = vmax.f32 %v217_v45, 0.0  ;;  %1632 = vmatprep.mubr.bf16.mxu0 %v3152_v2  ;;  %1205 = vperm.xlu1 %3088, %v3785_v37   ;;  %v3799_v45 = vld [vmem:[%s4485_s6 + $0x58] sm:$0xff] }
  0xec   :  { %v425_v54 = vpack.c.bf16 %v365_v48, %v363_v47  ;;  %v1809_v48 = vpop.permute.xlu0 %1808 }
  0xed   :  { %v426_v55 = vpack.c.bf16 %v366_v52, %v364_v51  ;;  %v220_v56 = vpop.f32.mrb[8].mxu0  ;;  %2904 = vmatpush3.bf16.msra.mxu1 %v3114_v46  ;;  %v3126_v51 = vld [vmem:[%s4482_s3 + $0x38] sm:$0xff]  }
  0xee   :  { %v221_v57 = vadd.f32 %v220_v56, %v3687_v17  ;;  %v222_v58 = vpop.f32.mrb[9].mxu0  ;;  %2905 = vmatprep.subr.bf16.mxu1 %v3115_v50 }
  0xef   :  { %v223_v60 = vadd.f32 %v222_v58, %v3691_v18  ;;  %v224_v61 = vpop.f32.mrb[10].mxu0  ;;  %886 = vmatprep.mubr.bf16.mxu1 %v426_v55  ;;  %1215 = vperm.xlu1 %3088, %v3799_v45  }
  0xf0   :  { %v225_v63 = vadd.f32 %v224_v61, %v3687_v17  ;;  %v226_v1 = vpop.f32.mrb[11].mxu0  ;;  %887 = vmatmul.mubr.bf16.gmra.mrb[36].mxu1 %v425_v54  ;;  %v367_v5 = vmax.f32 %v221_v57, 0.0 }
  0xf1   :  { %v227_v4 = vadd.f32 %v226_v1, %v3691_v18  ;;  %2906 = vmatpush3.bf16.msra.mxu1 %v3116_v31  ;;  %v368_v11 = vmax.f32 %v223_v60, 0.0  ;;  %v3813_v31 = vld [vmem:[%s4485_s6 + $0x68] sm:$0xff]  ;;  %v1811_v1 = vpop.permute.xlu1 %1810 }
  0xf2   :  { %v369_v7 = vmax.f32 %v225_v63, 0.0  ;;  %2719 = vmatmul.mubr.msk.bf16.gmra.mrb[116].mxu0 %vm117_vm0, %v3543_v34  ;;  %2907 = vmatprep.subr.bf16.mxu1 %v3117_v59  ;;  %v3120_v34 = vld [vmem:[%s4482_s3 + $0x20] sm:$0xff]  }
  0xf3   :  { %v370_v12 = vmax.f32 %v227_v4, 0.0  ;;  %1642 = vmatprep.mubr.bf16.mxu0 %v3152_v2  ;;  %1225 = vperm.xlu1 %3088, %v3813_v31   ;;  %v1157_v4 = vld [vmem:[%s4485_s6 + $0x78] sm:$0xff] }
  0xf4   :  { %v427_v14 = vpack.c.bf16 %v369_v7, %v367_v5  ;;  %v1813_v7 = vpop.permute.xlu0 %1812 }
  0xf5   :  { %v428_v6 = vpack.c.bf16 %v370_v12, %v368_v11  ;;  %v230_v15 = vpop.f32.mrb[12].mxu0  ;;  %2908 = vmatpush3.bf16.msra.mxu1 %v3118_v0 }
  0xf6   :  { %v231_v19 = vadd.f32 %v230_v15, %v3687_v17  ;;  %v232_v20 = vpop.f32.mrb[13].mxu0  ;;  %2909 = vmatprep.subr.bf16.mxu1 %v3119_v8 }
  0xf7   :  { %v233_v22 = vadd.f32 %v232_v20, %v3691_v18  ;;  %v234_v23 = vpop.f32.mrb[14].mxu0  ;;  %894 = vmatprep.mubr.bf16.mxu1 %v428_v6  ;;  %1235 = vperm.xlu1 %3088, %v1157_v4  }
  0xf8   :  { %v235_v25 = vadd.f32 %v234_v23, %v3687_v17  ;;  %v236_v26 = vpop.f32.mrb[15].mxu0  ;;  %895 = vmatmul.mubr.bf16.gmra.mrb[40].mxu1 %v427_v14  ;;  %v371_v30 = vmax.f32 %v231_v19, 0.0  ;;  %v1142_v14 = vld [vmem:[%s4485_s6] sm:$0xff]  ;;  %v1144_v23 = vld [vmem:[%s4485_s6 + $0x10] sm:$0xff] }
  0xf9   :  { %v237_v27 = vadd.f32 %v236_v26, %v3691_v18  ;;  %2910 = vmatpush3.bf16.msra.mxu1 %v3120_v34  ;;  %v372_v35 = vmax.f32 %v233_v22, 0.0  ;;  %1160 = vperm.xlu0 %3087, %v1142_v14  }
  0xfa   :  { %v373_v32 = vmax.f32 %v235_v25, 0.0  ;;  %2720 = vmatmul.mubr.msk.bf16.gmra.mrb[120].mxu0 %vm117_vm0, %v3556_v38  ;;  %2911 = vmatprep.subr.bf16.mxu1 %v3121_v21  ;;  %v3124_v38 = vld [vmem:[%s4482_s3 + $0x30] sm:$0xff]  }
  0xfb   :  { %v374_v36 = vmax.f32 %v237_v27, 0.0  ;;  %1652 = vmatprep.mubr.bf16.mxu0 %v3152_v2  ;;  %v3125_v2 = vld [vmem:[%s4482_s3 + $0x78] sm:$0xff]   ;;  %2462 = vperm.xlu1 %3088, %v1142_v14   ;;  %v1815_v27 = vpop.permute.xlu1 %1814  ;;  %v3866_v14 = vld [vmem:[%s4485_s6 + $0x60] sm:$0xff] }
  0xfc   :  { %v429_v39 = vpack.c.bf16 %v373_v32, %v371_v30  ;;  %v1817_v32 = vpop.permute.xlu0 %1816 }
  0xfd   :  { %v430_v40 = vpack.c.bf16 %v374_v36, %v372_v35  ;;  %v240_v41 = vpop.f32.mrb[16].mxu0  ;;  %2912 = vmatpush3.bf16.msra.mxu1 %v3122_v29  ;;  %1170 = vperm.xlu0 %3087, %v1144_v23  }
  0xfe   :  { %v241_v28 = vadd.f32 %v240_v41, %v3687_v17  ;;  %v242_v42 = vpop.f32.mrb[17].mxu0  ;;  %2913 = vmatprep.subr.bf16.mxu1 %v3123_v33 }
  0xff   :  { %v243_v43 = vadd.f32 %v242_v42, %v3691_v18  ;;  %v244_v44 = vpop.f32.mrb[18].mxu0  ;;  %902 = vmatprep.mubr.bf16.mxu1 %v430_v40  ;;  %2467 = vperm.xlu1 %3088, %v3723_v53  }
 0x100   :  { %v245_v46 = vadd.f32 %v244_v44, %v3687_v17  ;;  %v246_v47 = vpop.f32.mrb[19].mxu0  ;;  %903 = vmatmul.mubr.bf16.gmra.mrb[44].mxu1 %v429_v39  ;;  %v375_v52 = vmax.f32 %v241_v28, 0.0  ;;  %v1146_v39 = vld [vmem:[%s4485_s6 + $0x20] sm:$0xff] }
 0x101   :  { %v247_v50 = vadd.f32 %v246_v47, %v3691_v18  ;;  %2914 = vmatpush3.bf16.msra.mxu1 %v3124_v38  ;;  %v376_v55 = vmax.f32 %v243_v43, 0.0  ;;  %1180 = vperm.xlu0 %3087, %v1146_v39   ;;  %v1148_v43 = vld [vmem:[%s4485_s6 + $0x30] sm:$0xff]  ;;  %v1819_v47 = vpop.permute.xlu1 %1818 }
 0x102   :  { %v377_v54 = vmax.f32 %v245_v46, 0.0  ;;  %2721 = vmatmul.mubr.msk.bf16.gmra.mrb[124].mxu0 %vm117_vm0, %v3589_v49  ;;  %2915 = vmatprep.subr.bf16.mxu1 %v3125_v2 }
 0x103   :  { %v378_v56 = vmax.f32 %v247_v50, 0.0  ;;  %3049 = vmatprep.mubr.msk.bf16.mxu0 %vm536_vm2, %v1809_v48  ;;  %2472 = vperm.xlu1 %3088, %v1144_v23   ;;  %v3873_v23 = vld [vmem:[%s4485_s6 + $0x70] sm:$0xff] }
 0x104   :  { %v431_v57 = vpack.c.bf16 %v377_v54, %v375_v52 }
 0x105   :  { %v432_v58 = vpack.c.bf16 %v378_v56, %v376_v55  ;;  %v250_v59 = vpop.f32.mrb[20].mxu0  ;;  %2916 = vmatpush3.bf16.msra.mxu1 %v3126_v51  ;;  %1190 = vperm.xlu0 %3087, %v1148_v43   ;;  %v1821_v51 = vpop.permute.xlu0 %1820  ;;  %v1150_v56 = vld [vmem:[%s4485_s6 + $0x40] sm:$0xff] }
 0x106   :  { %v251_v60 = vadd.f32 %v250_v59, %v3687_v17  ;;  %v252_v61 = vpop.f32.mrb[21].mxu0 }
 0x107   :  { %v253_v49 = vadd.f32 %v252_v61, %v3691_v18  ;;  %v254_v63 = vpop.f32.mrb[22].mxu0  ;;  %910 = vmatprep.mubr.bf16.mxu1 %v432_v58  ;;  %2477 = vperm.xlu1 %3088, %v3737_v62  }
 0x108   :  { %v255_v0 = vadd.f32 %v254_v63, %v3687_v17  ;;  %v256_v5 = vpop.f32.mrb[23].mxu0  ;;  %911 = vmatmul.mubr.bf16.gmra.mrb[48].mxu1 %v431_v57  ;;  %v379_v11 = vmax.f32 %v251_v60, 0.0  ;;  %v1152_v63 = vld [vmem:[%s4485_s6 + $0x50] sm:$0xff] }
 0x109   :  { %v257_v8 = vadd.f32 %v256_v5, %v3691_v18  ;;  %v380_v6 = vmax.f32 %v253_v49, 0.0  ;;  %1200 = vperm.xlu0 %3087, %v1150_v56  }
 0x10a   :  { %v381_v12 = vmax.f32 %v255_v0, 0.0  ;;  %3050 = vmatmul.mubr.msk.bf16.vlgmr.msra.gmra.mrb[128].mxu0 %vm536_vm2, %v1811_v1  ;;  %v1823_v0 = vpop.permute.xlu1 %1822 }
 0x10b   :  { %v382_v15 = vmax.f32 %v257_v8, 0.0  ;;  %3053 = vmatprep.mubr.msk.bf16.mxu0 %vm536_vm2, %v1813_v7  ;;  %2482 = vperm.xlu1 %3088, %v1146_v39  }
 0x10c   :  { %v433_v34 = vpack.c.bf16 %v381_v12, %v379_v11 }
 0x10d   :  { %v434_v19 = vpack.c.bf16 %v382_v15, %v380_v6  ;;  %v260_v20 = vpop.f32.mrb[24].mxu0  ;;  %1210 = vperm.xlu0 %3087, %v1152_v63  }
 0x10e   :  { %v261_v21 = vadd.f32 %v260_v20, %v3687_v17  ;;  %v262_v22 = vpop.f32.mrb[25].mxu0 }
 0x10f   :  { %v263_v25 = vadd.f32 %v262_v22, %v3691_v18  ;;  %v264_v26 = vpop.f32.mrb[26].mxu0  ;;  %918 = vmatprep.mubr.bf16.mxu1 %v434_v19  ;;  %2487 = vperm.xlu1 %3088, %v3754_v3   ;;  %v1825_v3 = vpop.permute.xlu0 %1824 }
 0x110   :  { %v265_v29 = vadd.f32 %v264_v26, %v3687_v17  ;;  %v266_v30 = vpop.f32.mrb[27].mxu0  ;;  %919 = vmatmul.mubr.bf16.gmra.mrb[52].mxu1 %v433_v34  ;;  %v383_v35 = vmax.f32 %v261_v21, 0.0 }
 0x111   :  { %v267_v33 = vadd.f32 %v266_v30, %v3691_v18  ;;  %v384_v40 = vmax.f32 %v263_v25, 0.0  ;;  %1220 = vperm.xlu0 %3087, %v3866_v14  }
 0x112   :  { %v385_v36 = vmax.f32 %v265_v29, 0.0  ;;  %3054 = vmatmul.mubr.msk.bf16.gmra.mrb[132].mxu0 %vm536_vm2, %v1815_v27  ;;  %v1827_v27 = vpop.permute.xlu1 %1826 }
 0x113   :  { %v386_v41 = vmax.f32 %v267_v33, 0.0  ;;  %3057 = vmatprep.mubr.msk.bf16.mxu0 %vm536_vm2, %v1817_v32  ;;  %2492 = vperm.xlu1 %3088, %v1148_v43  }
 0x114   :  { %v435_v38 = vpack.c.bf16 %v385_v36, %v383_v35 }
 0x115   :  { %v436_v28 = vpack.c.bf16 %v386_v41, %v384_v40  ;;  %v270_v42 = vpop.f32.mrb[28].mxu0  ;;  %1230 = vperm.xlu0 %3087, %v3873_v23  }
 0x116   :  { %v271_v53 = vadd.f32 %v270_v42, %v3687_v17  ;;  %v272_v2 = vpop.f32.mrb[29].mxu0 }
 0x117   :  { %v273_v44 = vadd.f32 %v272_v2, %v3691_v18  ;;  %v274_v46 = vpop.f32.mrb[30].mxu0  ;;  %926 = vmatprep.mubr.bf16.mxu1 %v436_v28  ;;  %2497 = vperm.xlu1 %3088, %v3768_v24  }
 0x118   :  { %v275_v48 = vadd.f32 %v274_v46, %v3687_v17  ;;  %v276_v50 = vpop.f32.mrb[31].mxu0  ;;  %927 = vmatmul.mubr.bf16.gmra.mrb[56].mxu1 %v435_v38  ;;  %v387_v54 = vmax.f32 %v271_v53, 0.0 }
 0x119   :  { %v277_v52 = vadd.f32 %v276_v50, %v3691_v18  ;;  %v388_v57 = vmax.f32 %v273_v44, 0.0 }
 0x11a   :  { %v389_v55 = vmax.f32 %v275_v48, 0.0  ;;  %3058 = vmatmul.mubr.msk.bf16.gmra.mrb[136].mxu0 %vm536_vm2, %v1819_v47 }
 0x11b   :  { %v390_v58 = vmax.f32 %v277_v52, 0.0  ;;  %3061 = vmatprep.mubr.msk.bf16.mxu0 %vm536_vm2, %v1821_v51  ;;  %2502 = vperm.xlu1 %3088, %v1150_v56  }
 0x11c   :  { %v437_v59 = vpack.c.bf16 %v389_v55, %v387_v54  ;;  %v1829_v55 = vpop.permute.xlu0 %1828 }
 0x11d   :  { %v438_v60 = vpack.c.bf16 %v390_v58, %v388_v57  ;;  %v280_v61 = vpop.f32.mrb[32].mxu0  ;;  %v1831_v58 = vpop.permute.xlu1 %1830 }
 0x11e   :  { %v281_v62 = vadd.f32 %v280_v61, %v3687_v17  ;;  %v282_v49 = vpop.f32.mrb[33].mxu0 }
 0x11f   :  { %v283_v1 = vadd.f32 %v282_v49, %v3691_v18  ;;  %v284_v4 = vpop.f32.mrb[34].mxu0  ;;  %934 = vmatprep.mubr.bf16.mxu1 %v438_v60  ;;  %2507 = vperm.xlu1 %3088, %v3785_v37  }
 0x120   :  { %v285_v5 = vadd.f32 %v284_v4, %v3687_v17  ;;  %v286_v7 = vpop.f32.mrb[35].mxu0  ;;  %935 = vmatmul.mubr.bf16.gmra.mrb[60].mxu1 %v437_v59  ;;  %v391_v11 = vmax.f32 %v281_v62, 0.0 }
 0x121   :  { %v287_v8 = vadd.f32 %v286_v7, %v3691_v18  ;;  %v392_v6 = vmax.f32 %v283_v1, 0.0 }
 0x122   :  { %v393_v12 = vmax.f32 %v285_v5, 0.0  ;;  %3062 = vmatmul.mubr.msk.bf16.gmra.mrb[140].mxu0 %vm536_vm2, %v1823_v0 }
 0x123   :  { %v394_v15 = vmax.f32 %v287_v8, 0.0  ;;  %3065 = vmatprep.mubr.msk.bf16.mxu0 %vm536_vm2, %v1825_v3  ;;  %2512 = vperm.xlu1 %3088, %v1152_v63  }
 0x124   :  { %v439_v34 = vpack.c.bf16 %v393_v12, %v391_v11 }
 0x125   :  { %v440_v19 = vpack.c.bf16 %v394_v15, %v392_v6  ;;  %v290_v20 = vpop.f32.mrb[36].mxu0 }
 0x126   :  { %v291_v21 = vadd.f32 %v290_v20, %v3687_v17  ;;  %v292_v22 = vpop.f32.mrb[37].mxu0 }
 0x127   :  { %v293_v25 = vadd.f32 %v292_v22, %v3691_v18  ;;  %v294_v26 = vpop.f32.mrb[38].mxu0  ;;  %942 = vmatprep.mubr.bf16.mxu1 %v440_v19  ;;  %2517 = vperm.xlu1 %3088, %v3799_v45  }
 0x128   :  { %v295_v29 = vadd.f32 %v294_v26, %v3687_v17  ;;  %v296_v30 = vpop.f32.mrb[39].mxu0  ;;  %943 = vmatmul.mubr.bf16.gmra.mrb[64].mxu1 %v439_v34  ;;  %v395_v33 = vmax.f32 %v291_v21, 0.0  ;;  %v1833_v26 = vpop.permute.xlu0 %1832 }
 0x129   :  { %v297_v32 = vadd.f32 %v296_v30, %v3691_v18  ;;  %v396_v36 = vmax.f32 %v293_v25, 0.0  ;;  %v1835_v30 = vpop.permute.xlu1 %1834 }
 0x12a   :  { %v397_v35 = vmax.f32 %v295_v29, 0.0  ;;  %3066 = vmatmul.mubr.msk.bf16.gmra.mrb[144].mxu0 %vm536_vm2, %v1827_v27 }
 0x12b   :  { %v398_v39 = vmax.f32 %v297_v32, 0.0  ;;  %3069 = vmatprep.mubr.msk.bf16.mxu0 %vm536_vm2, %v1829_v55  ;;  %2522 = vperm.xlu1 %3088, %v3866_v14  }
 0x12c   :  { %v441_v40 = vpack.c.bf16 %v397_v35, %v395_v33 }
 0x12d   :  { %v442_v41 = vpack.c.bf16 %v398_v39, %v396_v36  ;;  %v300_v38 = vpop.f32.mrb[40].mxu0 }
 0x12e   :  { %v301_v28 = vadd.f32 %v300_v38, %v3687_v17  ;;  %v302_v42 = vpop.f32.mrb[41].mxu0 }
 0x12f   :  { %v303_v53 = vadd.f32 %v302_v42, %v3691_v18  ;;  %v304_v2 = vpop.f32.mrb[42].mxu0  ;;  %950 = vmatprep.mubr.bf16.mxu1 %v442_v41  ;;  %2527 = vperm.xlu1 %3088, %v3813_v31  }
 0x130   :  { %v305_v24 = vadd.f32 %v304_v2, %v3687_v17  ;;  %v306_v43 = vpop.f32.mrb[43].mxu0  ;;  %951 = vmatmul.mubr.bf16.gmra.mrb[68].mxu1 %v441_v40  ;;  %v399_v46 = vmax.f32 %v301_v28, 0.0 }
 0x131   :  { %v307_v44 = vadd.f32 %v306_v43, %v3691_v18  ;;  %v400_v48 = vmax.f32 %v303_v53, 0.0 }
 0x132   :  { %v401_v47 = vmax.f32 %v305_v24, 0.0  ;;  %3070 = vmatmul.mubr.msk.bf16.gmra.mrb[148].mxu0 %vm536_vm2, %v1831_v58 }
 0x133   :  { %v402_v50 = vmax.f32 %v307_v44, 0.0  ;;  %2532 = vperm.xlu1 %3088, %v3873_v23   ;;  %3073 = vmatprep.mubr.msk.bf16.mxu0 %vm536_vm2, %v1833_v26 }
 0x134   :  { %v443_v51 = vpack.c.bf16 %v401_v47, %v399_v46 }
 0x135   :  { %v444_v52 = vpack.c.bf16 %v402_v50, %v400_v48  ;;  %v310_v54 = vpop.f32.mrb[44].mxu0 }
 0x136   :  { %v311_v56 = vadd.f32 %v310_v54, %v3687_v17  ;;  %v312_v57 = vpop.f32.mrb[45].mxu0 }
 0x137   :  { %v313_v59 = vadd.f32 %v312_v57, %v3691_v18  ;;  %v314_v37 = vpop.f32.mrb[46].mxu0  ;;  %958 = vmatprep.mubr.bf16.mxu1 %v444_v52 }
 0x138   :  { %v315_v60 = vadd.f32 %v314_v37, %v3687_v17  ;;  %v316_v61 = vpop.f32.mrb[47].mxu0  ;;  %959 = vmatmul.mubr.bf16.gmra.mrb[72].mxu1 %v443_v51  ;;  %v403_v49 = vmax.f32 %v311_v56, 0.0 }
 0x139   :  { %v317_v62 = vadd.f32 %v316_v61, %v3691_v18  ;;  %v404_v1 = vmax.f32 %v313_v59, 0.0 }
 0x13a   :  { %v405_v63 = vmax.f32 %v315_v60, 0.0  ;;  %3074 = vmatmul.mubr.msk.bf16.gmra.mrb[152].mxu0 %vm536_vm2, %v1835_v30  ;;  %v1837_v60 = vpop.permute.xlu0 %1836 }
 0x13b   :  { %v406_v4 = vmax.f32 %v317_v62, 0.0  ;;  %3077 = vmatprep.mubr.msk.bf16.mxu0 %vm536_vm2, %v1837_v60 }
 0x13c   :  { %v445_v0 = vpack.c.bf16 %v405_v63, %v403_v49  ;;  %v1839_v49 = vpop.permute.xlu1 %1838 }
 0x13d   :  { %v446_v5 = vpack.c.bf16 %v406_v4, %v404_v1  ;;  %v320_v7 = vpop.f32.mrb[48].mxu0  ;;  %v1390_v4 = vld [vmem:[%s4481_s2] sm:$0x3] }
 0x13e   :  { %v321_v8 = vadd.f32 %v320_v7, %v3687_v17  ;;  %v322_v11 = vpop.f32.mrb[49].mxu0 }
 0x13f   :  { %v323_v12 = vadd.f32 %v322_v11, %v3691_v18  ;;  %v324_v6 = vpop.f32.mrb[50].mxu0  ;;  %966 = vmatprep.mubr.bf16.mxu1 %v446_v5 }
 0x140   :  { %v325_v45 = vadd.f32 %v324_v6, %v3687_v17  ;;  %v326_v15 = vpop.f32.mrb[51].mxu0  ;;  %967 = vmatmul.mubr.bf16.gmra.mrb[76].mxu1 %v445_v0  ;;  %v407_v19 = vmax.f32 %v321_v8, 0.0 }
 0x141   :  { %v327_v34 = vadd.f32 %v326_v15, %v3691_v18  ;;  %v408_v14 = vmax.f32 %v323_v12, 0.0 }
 0x142   :  { %v409_v20 = vmax.f32 %v325_v45, 0.0  ;;  %3078 = vmatmul.mubr.msk.bf16.gmra.mrb[156].mxu0 %vm536_vm2, %v1839_v49  ;;  %v3934_v45 = vrot.slane %v1390_v4, %v89_v13 }
 0x143   :  { %v410_v3 = vmax.f32 %v327_v34, 0.0 }
 0x144   :  { %v447_v21 = vpack.c.bf16 %v409_v20, %v407_v19 }
 0x145   :  { %v448_v22 = vpack.c.bf16 %v410_v3, %v408_v14  ;;  %v330_v25 = vpop.f32.mrb[52].mxu0 }
 0x146   :  { %v331_v27 = vadd.f32 %v330_v25, %v3687_v17  ;;  %v332_v29 = vpop.f32.mrb[53].mxu0 }
 0x147   :  { %v333_v31 = vadd.f32 %v332_v29, %v3691_v18  ;;  %v334_v32 = vpop.f32.mrb[54].mxu0  ;;  %974 = vmatprep.mubr.bf16.mxu1 %v448_v22 }
 0x148   :  { %v335_v33 = vadd.f32 %v334_v32, %v3687_v17  ;;  %v336_v35 = vpop.f32.mrb[55].mxu0  ;;  %975 = vmatmul.mubr.bf16.gmra.mrb[80].mxu1 %v447_v21  ;;  %v411_v36 = vmax.f32 %v331_v27, 0.0 }
 0x149   :  { %v337_v23 = vadd.f32 %v336_v35, %v3691_v18  ;;  %v412_v40 = vmax.f32 %v333_v31, 0.0 }
 0x14a   :  { %v413_v39 = vmax.f32 %v335_v33, 0.0 }
 0x14b   :  { %v414_v41 = vmax.f32 %v337_v23, 0.0 }
 0x14c   :  { %v449_v38 = vpack.c.bf16 %v413_v39, %v411_v36 }
 0x14d   :  { %v450_v28 = vpack.c.bf16 %v414_v41, %v412_v40  ;;  %v340_v42 = vpop.f32.mrb[56].mxu0 }
 0x14e   :  { %v341_v53 = vadd.f32 %v340_v42, %v3687_v17  ;;  %v342_v2 = vpop.f32.mrb[57].mxu0 }
 0x14f   :  { %v343_v24 = vadd.f32 %v342_v2, %v3691_v18  ;;  %v344_v43 = vpop.f32.mrb[58].mxu0  ;;  %982 = vmatprep.mubr.bf16.mxu1 %v450_v28  ;;  %v3910_v47 = vpop.f32.mrb[0].mxu1 }
 0x150   :  { %v345_v44 = vadd.f32 %v344_v43, %v3687_v17  ;;  %v346_v46 = vpop.f32.mrb[59].mxu0  ;;  %983 = vmatmul.mubr.bf16.gmra.mrb[84].mxu1 %v449_v38  ;;  %v3913_v50 = vpop.f32.mrb[1].mxu1  ;;  %v415_v51 = vmax.f32 %v341_v53, 0.0 }
 0x151   :  { %v347_v48 = vadd.f32 %v346_v46, %v3691_v18  ;;  %v3915_v54 = vpop.f32.mrb[2].mxu1  ;;  %v416_v55 = vmax.f32 %v343_v24, 0.0 }
 0x152   :  { %v417_v52 = vmax.f32 %v345_v44, 0.0  ;;  %v3917_v57 = vpop.f32.mrb[3].mxu1 }
 0x153   :  { %v418_v56 = vmax.f32 %v347_v48, 0.0 }
 0x154   :  { %v451_v58 = vpack.c.bf16 %v417_v52, %v415_v51 }
 0x155   :  { %v452_v59 = vpack.c.bf16 %v418_v56, %v416_v55  ;;  %v350_v37 = vpop.f32.mrb[60].mxu0 }
 0x156   :  { %v351_v61 = vadd.f32 %v350_v37, %v3687_v17  ;;  %v352_v62 = vpop.f32.mrb[61].mxu0 }
 0x157   :  { %v353_v63 = vadd.f32 %v352_v62, %v3691_v18  ;;  %v354_v1 = vpop.f32.mrb[62].mxu0  ;;  %990 = vmatprep.mubr.bf16.mxu1 %v452_v59  ;;  %v3927_v7 = vpop.f32.mrb[4].mxu1 }
 0x158   :  { %v355_v0 = vadd.f32 %v354_v1, %v3687_v17  ;;  %v356_v5 = vpop.f32.mrb[63].mxu0  ;;  %991 = vmatmul.mubr.bf16.gmra.mrb[88].mxu1 %v451_v58  ;;  %v3930_v11 = vpop.f32.mrb[5].mxu1  ;;  %v419_v12 = vmax.f32 %v351_v61, 0.0  ;;  %v3940_v17 = vrot.slane %v1390_v4, %v93_v16 }
 0x159   :  { %v357_v8 = vadd.f32 %v356_v5, %v3691_v18  ;;  %v3936_v15 = vpop.f32.mrb[6].mxu1  ;;  %v420_v34 = vmax.f32 %v353_v63, 0.0 }
 0x15a   :  { %v421_v6 = vmax.f32 %v355_v0, 0.0  ;;  %v3942_v20 = vpop.f32.mrb[7].mxu1 }
 0x15b   :  { %v422_v19 = vmax.f32 %v357_v8, 0.0 }
 0x15c   :  { %v453_v14 = vpack.c.bf16 %v421_v6, %v419_v12 }
 0x15d   :  { %v454_v18 = vpack.c.bf16 %v422_v19, %v420_v34  ;;  %v1504_v3 = vpop.f32.mrb[64].mxu0 }
 0x15e   :  { %v1505_v21 = vadd.f32 %v1504_v3, %v3934_v45  ;;  %v1506_v22 = vpop.f32.mrb[65].mxu0 }
 0x15f   :  { %v1507_v25 = vadd.f32 %v1506_v22, %v3940_v17  ;;  %998 = vmatprep.mubr.bf16.mxu1 %v454_v18  ;;  %v1508_v13 = vpop.f32.mrb[66].mxu0  ;;  %v3947_v29 = vpop.f32.mrb[8].mxu1 }
 0x160   :  { %v1509_v26 = vadd.f32 %v1508_v13, %v3934_v45  ;;  %999 = vmatmul.mubr.bf16.gmra.mrb[92].mxu1 %v453_v14  ;;  %v1510_v27 = vpop.f32.mrb[67].mxu0  ;;  %v3950_v30 = vpop.f32.mrb[9].mxu1  ;;  %v1663_v31 = vmax.f32 %v1505_v21, 0.0 }
 0x161   :  { %v1511_v16 = vadd.f32 %v1510_v27, %v3940_v17  ;;  %v3952_v33 = vpop.f32.mrb[10].mxu1  ;;  %v1664_v35 = vmax.f32 %v1507_v25, 0.0 }
 0x162   :  { %v1665_v32 = vmax.f32 %v1509_v26, 0.0  ;;  %v3954_v36 = vpop.f32.mrb[11].mxu1 }
 0x163   :  { %v1666_v23 = vmax.f32 %v1511_v16, 0.0 }
 0x164   :  { %v1727_v39 = vpack.c.bf16 %v1665_v32, %v1663_v31 }
 0x165   :  { %v1728_v40 = vpack.c.bf16 %v1666_v23, %v1664_v35  ;;  %v1514_v41 = vpop.f32.mrb[68].mxu0 }
 0x166   :  { %v1515_v38 = vadd.f32 %v1514_v41, %v3934_v45  ;;  %v1516_v28 = vpop.f32.mrb[69].mxu0 }
 0x167   :  { %v1517_v42 = vadd.f32 %v1516_v28, %v3940_v17  ;;  %v1518_v53 = vpop.f32.mrb[70].mxu0  ;;  %2180 = vmatprep.mubr.bf16.mxu1 %v1728_v40  ;;  %v3959_v43 = vpop.f32.mrb[12].mxu1 }
 0x168   :  { %v1519_v2 = vadd.f32 %v1518_v53, %v3934_v45  ;;  %v1520_v24 = vpop.f32.mrb[71].mxu0  ;;  %2181 = vmatmul.mubr.bf16.vlgmr.msra.gmra.mrb[96].mxu1 %v1727_v39  ;;  %v3962_v46 = vpop.f32.mrb[13].mxu1  ;;  %v1667_v48 = vmax.f32 %v1515_v38, 0.0 }
 0x169   :  { %v1521_v44 = vadd.f32 %v1520_v24, %v3940_v17  ;;  %v3964_v52 = vpop.f32.mrb[14].mxu1  ;;  %v1668_v55 = vmax.f32 %v1517_v42, 0.0 }
 0x16a   :  { %v1669_v51 = vmax.f32 %v1519_v2, 0.0  ;;  %v3966_v58 = vpop.f32.mrb[15].mxu1 }
 0x16b   :  { %v1670_v56 = vmax.f32 %v1521_v44, 0.0 }
 0x16c   :  { %v1729_v59 = vpack.c.bf16 %v1669_v51, %v1667_v48 }
 0x16d   :  { %v1730_v37 = vpack.c.bf16 %v1670_v56, %v1668_v55  ;;  %v1524_v60 = vpop.f32.mrb[72].mxu0 }
 0x16e   :  { %v1525_v61 = vadd.f32 %v1524_v60, %v3934_v45  ;;  %v1526_v62 = vpop.f32.mrb[73].mxu0 }
 0x16f   :  { %v1527_v49 = vadd.f32 %v1526_v62, %v3940_v17  ;;  %v1528_v63 = vpop.f32.mrb[74].mxu0  ;;  %2188 = vmatprep.mubr.bf16.mxu1 %v1730_v37  ;;  %v3971_v0 = vpop.f32.mrb[16].mxu1 }
 0x170   :  { %v1529_v1 = vadd.f32 %v1528_v63, %v3934_v45  ;;  %v1530_v4 = vpop.f32.mrb[75].mxu0  ;;  %2189 = vmatmul.mubr.bf16.gmra.mrb[100].mxu1 %v1729_v59  ;;  %v3974_v8 = vpop.f32.mrb[17].mxu1  ;;  %v1671_v12 = vmax.f32 %v1525_v61, 0.0 }
 0x171   :  { %v1531_v5 = vadd.f32 %v1530_v4, %v3940_v17  ;;  %v3976_v34 = vpop.f32.mrb[18].mxu1  ;;  %v1672_v19 = vmax.f32 %v1527_v49, 0.0 }
 0x172   :  { %v1673_v6 = vmax.f32 %v1529_v1, 0.0  ;;  %v3978_v18 = vpop.f32.mrb[19].mxu1 }
 0x173   :  { %v1674_v14 = vmax.f32 %v1531_v5, 0.0 }
 0x174   :  { %v1731_v3 = vpack.c.bf16 %v1673_v6, %v1671_v12 }
 0x175   :  { %v1732_v21 = vpack.c.bf16 %v1674_v14, %v1672_v19  ;;  %v1534_v22 = vpop.f32.mrb[76].mxu0 }
 0x176   :  { %v1535_v25 = vadd.f32 %v1534_v22, %v3934_v45  ;;  %v1536_v13 = vpop.f32.mrb[77].mxu0 }
 0x177   :  { %v1537_v26 = vadd.f32 %v1536_v13, %v3940_v17  ;;  %v1538_v27 = vpop.f32.mrb[78].mxu0  ;;  %2196 = vmatprep.mubr.bf16.mxu1 %v1732_v21  ;;  %v3983_v32 = vpop.f32.mrb[20].mxu1 }
 0x178   :  { %v1539_v16 = vadd.f32 %v1538_v27, %v3934_v45  ;;  %v1540_v31 = vpop.f32.mrb[79].mxu0  ;;  %2197 = vmatmul.mubr.bf16.gmra.mrb[104].mxu1 %v1731_v3  ;;  %v3986_v23 = vpop.f32.mrb[21].mxu1  ;;  %v1675_v39 = vmax.f32 %v1535_v25, 0.0 }
 0x179   :  { %v1541_v35 = vadd.f32 %v1540_v31, %v3940_v17  ;;  %v3988_v41 = vpop.f32.mrb[22].mxu1  ;;  %v1676_v38 = vmax.f32 %v1537_v26, 0.0 }
 0x17a   :  { %v1677_v40 = vmax.f32 %v1539_v16, 0.0  ;;  %v3990_v42 = vpop.f32.mrb[23].mxu1 }
 0x17b   :  { %v1678_v28 = vmax.f32 %v1541_v35, 0.0 }
 0x17c   :  { %v1733_v53 = vpack.c.bf16 %v1677_v40, %v1675_v39 }
 0x17d   :  { %v1734_v2 = vpack.c.bf16 %v1678_v28, %v1676_v38  ;;  %v1544_v24 = vpop.f32.mrb[80].mxu0 }
 0x17e   :  { %v1545_v44 = vadd.f32 %v1544_v24, %v3934_v45  ;;  %v1546_v48 = vpop.f32.mrb[81].mxu0 }
 0x17f   :  { %v1547_v51 = vadd.f32 %v1546_v48, %v3940_v17  ;;  %v1548_v55 = vpop.f32.mrb[82].mxu0  ;;  %2204 = vmatprep.mubr.bf16.mxu1 %v1734_v2  ;;  %v3995_v37 = vpop.f32.mrb[24].mxu1 }
 0x180   :  { %v1549_v56 = vadd.f32 %v1548_v55, %v3934_v45  ;;  %v1550_v59 = vpop.f32.mrb[83].mxu0  ;;  %2205 = vmatmul.mubr.bf16.gmra.mrb[108].mxu1 %v1733_v53  ;;  %v3998_v61 = vpop.f32.mrb[25].mxu1  ;;  %v1679_v62 = vmax.f32 %v1545_v44, 0.0 }
 0x181   :  { %v1551_v60 = vadd.f32 %v1550_v59, %v3940_v17  ;;  %v4000_v63 = vpop.f32.mrb[26].mxu1  ;;  %v1680_v1 = vmax.f32 %v1547_v51, 0.0 }
 0x182   :  { %v1681_v49 = vmax.f32 %v1549_v56, 0.0  ;;  %v4002_v5 = vpop.f32.mrb[27].mxu1 }
 0x183   :  { %v1682_v4 = vmax.f32 %v1551_v60, 0.0 }
 0x184   :  { %v1735_v12 = vpack.c.bf16 %v1681_v49, %v1679_v62 }
 0x185   :  { %v1736_v6 = vpack.c.bf16 %v1682_v4, %v1680_v1  ;;  %v1554_v19 = vpop.f32.mrb[84].mxu0 }
 0x186   :  { %v1555_v14 = vadd.f32 %v1554_v19, %v3934_v45  ;;  %v1556_v3 = vpop.f32.mrb[85].mxu0 }
 0x187   :  { %v1557_v21 = vadd.f32 %v1556_v3, %v3940_v17  ;;  %v1558_v22 = vpop.f32.mrb[86].mxu0  ;;  %2212 = vmatprep.mubr.bf16.mxu1 %v1736_v6  ;;  %v4007_v26 = vpop.f32.mrb[28].mxu1 }
 0x188   :  { %v1559_v25 = vadd.f32 %v1558_v22, %v3934_v45  ;;  %v1560_v13 = vpop.f32.mrb[87].mxu0  ;;  %2213 = vmatmul.mubr.bf16.gmra.mrb[112].mxu1 %v1735_v12  ;;  %v4010_v16 = vpop.f32.mrb[29].mxu1  ;;  %v1683_v31 = vmax.f32 %v1555_v14, 0.0 }
 0x189   :  { %v1561_v27 = vadd.f32 %v1560_v13, %v3940_v17  ;;  %v4012_v39 = vpop.f32.mrb[30].mxu1  ;;  %v1684_v40 = vmax.f32 %v1557_v21, 0.0 }
 0x18a   :  { %v1685_v35 = vmax.f32 %v1559_v25, 0.0  ;;  %v4014_v28 = vpop.f32.mrb[31].mxu1 }
 0x18b   :  { %v1686_v38 = vmax.f32 %v1561_v27, 0.0 }
 0x18c   :  { %v1737_v53 = vpack.c.bf16 %v1685_v35, %v1683_v31 }
 0x18d   :  { %v1738_v2 = vpack.c.bf16 %v1686_v38, %v1684_v40  ;;  %v1564_v24 = vpop.f32.mrb[88].mxu0 }
 0x18e   :  { %v1565_v44 = vadd.f32 %v1564_v24, %v3934_v45  ;;  %v1566_v48 = vpop.f32.mrb[89].mxu0 }
 0x18f   :  { %v1567_v51 = vadd.f32 %v1566_v48, %v3940_v17  ;;  %v1568_v55 = vpop.f32.mrb[90].mxu0  ;;  %2220 = vmatprep.mubr.bf16.mxu1 %v1738_v2 }
 0x190   :  { %v1569_v56 = vadd.f32 %v1568_v55, %v3934_v45  ;;  %v1570_v59 = vpop.f32.mrb[91].mxu0  ;;  %2221 = vmatmul.mubr.bf16.gmra.mrb[116].mxu1 %v1737_v53  ;;  %v1687_v62 = vmax.f32 %v1565_v44, 0.0 }
 0x191   :  { %v1571_v60 = vadd.f32 %v1570_v59, %v3940_v17  ;;  %v1688_v1 = vmax.f32 %v1567_v51, 0.0 }
 0x192   :  { %v1689_v49 = vmax.f32 %v1569_v56, 0.0 }
 0x193   :  { %v1690_v4 = vmax.f32 %v1571_v60, 0.0 }
 0x194   :  { %v1739_v12 = vpack.c.bf16 %v1689_v49, %v1687_v62 }
 0x195   :  { %v1740_v6 = vpack.c.bf16 %v1690_v4, %v1688_v1  ;;  %v1574_v19 = vpop.f32.mrb[92].mxu0 }
 0x196   :  { %v1575_v14 = vadd.f32 %v1574_v19, %v3934_v45  ;;  %v1576_v3 = vpop.f32.mrb[93].mxu0 }
 0x197   :  { %v1577_v21 = vadd.f32 %v1576_v3, %v3940_v17  ;;  %v1578_v22 = vpop.f32.mrb[94].mxu0  ;;  %2228 = vmatprep.mubr.bf16.mxu1 %v1740_v6 }
 0x198   :  { %v1579_v25 = vadd.f32 %v1578_v22, %v3934_v45  ;;  %v1580_v13 = vpop.f32.mrb[95].mxu0  ;;  %2229 = vmatmul.mubr.bf16.gmra.mrb[120].mxu1 %v1739_v12  ;;  %v1691_v31 = vmax.f32 %v1575_v14, 0.0 }
 0x199   :  { %v1581_v27 = vadd.f32 %v1580_v13, %v3940_v17  ;;  %v1692_v40 = vmax.f32 %v1577_v21, 0.0 }
 0x19a   :  { %v1693_v35 = vmax.f32 %v1579_v25, 0.0 }
 0x19b   :  { %v1694_v38 = vmax.f32 %v1581_v27, 0.0 }
 0x19c   :  { %v1741_v53 = vpack.c.bf16 %v1693_v35, %v1691_v31 }
 0x19d   :  { %v1742_v2 = vpack.c.bf16 %v1694_v38, %v1692_v40  ;;  %v1584_v24 = vpop.f32.mrb[96].mxu0 }
 0x19e   :  { %v1585_v44 = vadd.f32 %v1584_v24, %v3934_v45  ;;  %v1586_v48 = vpop.f32.mrb[97].mxu0 }
 0x19f   :  { %v1587_v51 = vadd.f32 %v1586_v48, %v3940_v17  ;;  %v1588_v55 = vpop.f32.mrb[98].mxu0  ;;  %2236 = vmatprep.mubr.bf16.mxu1 %v1742_v2 }
 0x1a0   :  { %v1589_v56 = vadd.f32 %v1588_v55, %v3934_v45  ;;  %v1590_v59 = vpop.f32.mrb[99].mxu0  ;;  %2237 = vmatmul.mubr.bf16.gmra.mrb[124].mxu1 %v1741_v53  ;;  %v1695_v62 = vmax.f32 %v1585_v44, 0.0 }
 0x1a1   :  { %v1591_v60 = vadd.f32 %v1590_v59, %v3940_v17  ;;  %v1696_v1 = vmax.f32 %v1587_v51, 0.0 }
 0x1a2   :  { %v1697_v49 = vmax.f32 %v1589_v56, 0.0 }
 0x1a3   :  { %v1698_v4 = vmax.f32 %v1591_v60, 0.0 }
 0x1a4   :  { %v1743_v12 = vpack.c.bf16 %v1697_v49, %v1695_v62 }
 0x1a5   :  { %v1744_v6 = vpack.c.bf16 %v1698_v4, %v1696_v1  ;;  %v1594_v19 = vpop.f32.mrb[100].mxu0 }
 0x1a6   :  { %v1595_v14 = vadd.f32 %v1594_v19, %v3934_v45  ;;  %v1596_v3 = vpop.f32.mrb[101].mxu0 }
 0x1a7   :  { %v1597_v21 = vadd.f32 %v1596_v3, %v3940_v17  ;;  %v1598_v22 = vpop.f32.mrb[102].mxu0  ;;  %2244 = vmatprep.mubr.bf16.mxu1 %v1744_v6 }
 0x1a8   :  { %v1599_v25 = vadd.f32 %v1598_v22, %v3934_v45  ;;  %v1600_v13 = vpop.f32.mrb[103].mxu0  ;;  %2245 = vmatmul.mubr.bf16.gmra.mrb[128].mxu1 %v1743_v12  ;;  %v1699_v31 = vmax.f32 %v1595_v14, 0.0 }
 0x1a9   :  { %v1601_v27 = vadd.f32 %v1600_v13, %v3940_v17  ;;  %v1700_v40 = vmax.f32 %v1597_v21, 0.0 }
 0x1aa   :  { %v1701_v35 = vmax.f32 %v1599_v25, 0.0 }
 0x1ab   :  { %v1702_v38 = vmax.f32 %v1601_v27, 0.0 }
 0x1ac   :  { %v1745_v53 = vpack.c.bf16 %v1701_v35, %v1699_v31 }
 0x1ad   :  { %v1746_v2 = vpack.c.bf16 %v1702_v38, %v1700_v40  ;;  %v1604_v24 = vpop.f32.mrb[104].mxu0 }
 0x1ae   :  { %v1605_v44 = vadd.f32 %v1604_v24, %v3934_v45  ;;  %v1606_v48 = vpop.f32.mrb[105].mxu0 }
 0x1af   :  { %v1607_v51 = vadd.f32 %v1606_v48, %v3940_v17  ;;  %v1608_v55 = vpop.f32.mrb[106].mxu0  ;;  %2252 = vmatprep.mubr.bf16.mxu1 %v1746_v2 }
 0x1b0   :  { %v1609_v56 = vadd.f32 %v1608_v55, %v3934_v45  ;;  %v1610_v59 = vpop.f32.mrb[107].mxu0  ;;  %2253 = vmatmul.mubr.bf16.gmra.mrb[132].mxu1 %v1745_v53  ;;  %v1703_v62 = vmax.f32 %v1605_v44, 0.0 }
 0x1b1   :  { %v1611_v60 = vadd.f32 %v1610_v59, %v3940_v17  ;;  %v1704_v1 = vmax.f32 %v1607_v51, 0.0 }
 0x1b2   :  { %v1705_v49 = vmax.f32 %v1609_v56, 0.0 }
 0x1b3   :  { %v1706_v4 = vmax.f32 %v1611_v60, 0.0  ;;  %v4044_v60 = vld [vmem:[%s4484_s5] ss:$0 sm:$0xff] }
 0x1b4   :  { %v1747_v12 = vpack.c.bf16 %v1705_v49, %v1703_v62 }
 0x1b5   :  { %v1748_v6 = vpack.c.bf16 %v1706_v4, %v1704_v1  ;;  %v1614_v19 = vpop.f32.mrb[108].mxu0 }
 0x1b6   :  { %v1615_v14 = vadd.f32 %v1614_v19, %v3934_v45  ;;  %v1616_v3 = vpop.f32.mrb[109].mxu0 }
 0x1b7   :  { %v1617_v21 = vadd.f32 %v1616_v3, %v3940_v17  ;;  %v1618_v22 = vpop.f32.mrb[110].mxu0  ;;  %2260 = vmatprep.mubr.bf16.mxu1 %v1748_v6 }
 0x1b8   :  { %v1619_v25 = vadd.f32 %v1618_v22, %v3934_v45  ;;  %v1620_v13 = vpop.f32.mrb[111].mxu0  ;;  %2261 = vmatmul.mubr.bf16.gmra.mrb[136].mxu1 %v1747_v12  ;;  %v1707_v31 = vmax.f32 %v1615_v14, 0.0 }
 0x1b9   :  { %v1621_v27 = vadd.f32 %v1620_v13, %v3940_v17  ;;  %v1708_v40 = vmax.f32 %v1617_v21, 0.0 }
 0x1ba   :  { %v1709_v35 = vmax.f32 %v1619_v25, 0.0 }
 0x1bb   :  { %v1710_v38 = vmax.f32 %v1621_v27, 0.0  ;;  %v2788_v53 = vpop.f32.mrb[32].mxu1 }
 0x1bc   :  { %v1749_v2 = vpack.c.bf16 %v1709_v35, %v1707_v31  ;;  %v2789_v24 = vpop.f32.mrb[33].mxu1 }
 0x1bd   :  { %v1750_v44 = vpack.c.bf16 %v1710_v38, %v1708_v40  ;;  %v2790_v48 = vadd.f32 %v2789_v24, %v2788_v53  ;;  %v2791_v51 = vpop.f32.mrb[34].mxu1  ;;  %v1624_v55 = vpop.f32.mrb[112].mxu0 }
 0x1be   :  { %v1625_v56 = vadd.f32 %v1624_v55, %v3934_v45  ;;  %v2792_v59 = vpop.f32.mrb[35].mxu1  ;;  %v1626_v62 = vpop.f32.mrb[113].mxu0 }
 0x1bf   :  { %v881_v49 = vadd.f32 %v2790_v48, %v3913_v50  ;;  %v2793_v1 = vadd.f32 %v2792_v59, %v2791_v51  ;;  %v1627_v4 = vadd.f32 %v1626_v62, %v3940_v17  ;;  %v1628_v12 = vpop.f32.mrb[114].mxu0  ;;  %2268 = vmatprep.mubr.bf16.mxu1 %v1750_v44 }
 0x1c0   :  { %v1629_v6 = vadd.f32 %v1628_v12, %v3934_v45  ;;  %v1630_v19 = vpop.f32.mrb[115].mxu0  ;;  %2269 = vmatmul.mubr.bf16.gmra.mrb[140].mxu1 %v1749_v2  ;;  %v1711_v22 = vmax.f32 %v1625_v56, 0.0 }
 0x1c1   :  { %v884_v14 = vadd.f32 %v2793_v1, %v3917_v57  ;;  %v1631_v3 = vadd.f32 %v1630_v19, %v3940_v17  ;;  %v1014_v21 = vadd.f32 %v4044_v60, %v881_v49  ;;  %v1712_v50 = vmax.f32 %v1627_v4, 0.0 }
 0x1c2   :  { %v1713_v25 = vmax.f32 %v1629_v6, 0.0 }
 0x1c3   :  { %v1015_v13 = vadd.f32 %v4044_v60, %v884_v14  ;;  %v1714_v27 = vmax.f32 %v1631_v3, 0.0  ;;  %v2794_v31 = vpop.f32.mrb[36].mxu1  ;;  %v1046_v35 = vmax.f32 %v1014_v21, 0.0 }
 0x1c4   :  { %v1751_v40 = vpack.c.bf16 %v1713_v25, %v1711_v22  ;;  %v2795_v38 = vpop.f32.mrb[37].mxu1 }
 0x1c5   :  { %v1752_v53 = vpack.c.bf16 %v1714_v27, %v1712_v50  ;;  %v2796_v24 = vadd.f32 %v2795_v38, %v2794_v31  ;;  %v2797_v44 = vpop.f32.mrb[38].mxu1  ;;  %v1634_v2 = vpop.f32.mrb[116].mxu0  ;;  %1078 = vxpose.xlu0.b32.start [1/16] %v1046_v35, 128  ;;  %v1047_v55 = vmax.f32 %v1015_v13, 0.0 }
 0x1c6   :  { %v1635_v57 = vadd.f32 %v1634_v2, %v3934_v45  ;;  %v2798_v48 = vpop.f32.mrb[39].mxu1  ;;  %v1636_v51 = vpop.f32.mrb[117].mxu0 }
 0x1c7   :  { %v889_v56 = vadd.f32 %v3910_v47, %v2796_v24  ;;  %v2799_v59 = vadd.f32 %v2798_v48, %v2797_v44  ;;  %v1637_v62 = vadd.f32 %v1636_v51, %v3940_v17  ;;  %v1638_v49 = vpop.f32.mrb[118].mxu0  ;;  %2276 = vmatprep.mubr.bf16.mxu1 %v1752_v53 }
 0x1c8   :  { %v1639_v1 = vadd.f32 %v1638_v49, %v3934_v45  ;;  %v1640_v4 = vpop.f32.mrb[119].mxu0  ;;  %2277 = vmatmul.mubr.bf16.gmra.mrb[144].mxu1 %v1751_v40  ;;  %v1715_v14 = vmax.f32 %v1635_v57, 0.0 }
 0x1c9   :  { %v1016_v12 = vadd.f32 %v4044_v60, %v889_v56  ;;  %v892_v6 = vadd.f32 %v3915_v54, %v2799_v59  ;;  %v1641_v19 = vadd.f32 %v1640_v4, %v3940_v17  ;;  %1079 = vxpose.xlu0.b32.cont [2/16] %v1047_v55, 128  ;;  %v1716_v22 = vmax.f32 %v1637_v62, 0.0 }
 0x1ca   :  { %v1717_v3 = vmax.f32 %v1639_v1, 0.0 }
 0x1cb   :  { %v1048_v21 = vmax.f32 %v1016_v12, 0.0  ;;  %v1017_v47 = vadd.f32 %v4044_v60, %v892_v6  ;;  %v1718_v25 = vmax.f32 %v1641_v19, 0.0  ;;  %v2800_v13 = vpop.f32.mrb[40].mxu1 }
 0x1cc   :  { %v1753_v50 = vpack.c.bf16 %v1717_v3, %v1715_v14  ;;  %v2801_v27 = vpop.f32.mrb[41].mxu1 }
 0x1cd   :  { %v1754_v31 = vpack.c.bf16 %v1718_v25, %v1716_v22  ;;  %v2802_v35 = vadd.f32 %v2801_v27, %v2800_v13  ;;  %v2803_v40 = vpop.f32.mrb[42].mxu1  ;;  %v1644_v38 = vpop.f32.mrb[120].mxu0  ;;  %1080 = vxpose.xlu0.b32.cont [3/16] %v1048_v21, 128  ;;  %v1049_v44 = vmax.f32 %v1017_v47, 0.0 }
 0x1ce   :  { %v1645_v54 = vadd.f32 %v1644_v38, %v3934_v45  ;;  %v2804_v53 = vpop.f32.mrb[43].mxu1  ;;  %v1646_v24 = vpop.f32.mrb[121].mxu0 }
 0x1cf   :  { %v897_v2 = vadd.f32 %v2802_v35, %v3930_v11  ;;  %v2805_v57 = vadd.f32 %v2804_v53, %v2803_v40  ;;  %v1647_v48 = vadd.f32 %v1646_v24, %v3940_v17  ;;  %v1648_v51 = vpop.f32.mrb[122].mxu0  ;;  %2284 = vmatprep.mubr.bf16.mxu1 %v1754_v31 }
 0x1d0   :  { %v1649_v55 = vadd.f32 %v1648_v51, %v3934_v45  ;;  %v1650_v56 = vpop.f32.mrb[123].mxu0  ;;  %2285 = vmatmul.mubr.bf16.gmra.mrb[148].mxu1 %v1753_v50  ;;  %v1719_v1 = vmax.f32 %v1645_v54, 0.0 }
 0x1d1   :  { %v1018_v59 = vadd.f32 %v4044_v60, %v897_v2  ;;  %v900_v62 = vadd.f32 %v2805_v57, %v3942_v20  ;;  %v1651_v49 = vadd.f32 %v1650_v56, %v3940_v17  ;;  %1081 = vxpose.xlu0.b32.cont [4/16] %v1049_v44, 128  ;;  %v1720_v6 = vmax.f32 %v1647_v48, 0.0 }
 0x1d2   :  { %v1721_v4 = vmax.f32 %v1649_v55, 0.0 }
 0x1d3   :  { %v1050_v12 = vmax.f32 %v1018_v59, 0.0  ;;  %v1019_v11 = vadd.f32 %v4044_v60, %v900_v62  ;;  %v1722_v19 = vmax.f32 %v1651_v49, 0.0  ;;  %v2806_v14 = vpop.f32.mrb[44].mxu1 }
 0x1d4   :  { %v1755_v3 = vpack.c.bf16 %v1721_v4, %v1719_v1  ;;  %v2807_v21 = vpop.f32.mrb[45].mxu1 }
 0x1d5   :  { %v1756_v47 = vpack.c.bf16 %v1722_v19, %v1720_v6  ;;  %v2808_v22 = vadd.f32 %v2807_v21, %v2806_v14  ;;  %v2809_v25 = vpop.f32.mrb[46].mxu1  ;;  %v1654_v13 = vpop.f32.mrb[124].mxu0  ;;  %1082 = vxpose.xlu0.b32.cont [5/16] %v1050_v12, 128  ;;  %v1051_v31 = vmax.f32 %v1019_v11, 0.0 }
 0x1d6   :  { %v1655_v20 = vadd.f32 %v1654_v13, %v3934_v45  ;;  %v2810_v50 = vpop.f32.mrb[47].mxu1  ;;  %v1656_v27 = vpop.f32.mrb[125].mxu0 }
 0x1d7   :  { %v905_v35 = vadd.f32 %v3927_v7, %v2808_v22  ;;  %v2811_v40 = vadd.f32 %v2810_v50, %v2809_v25  ;;  %v1657_v38 = vadd.f32 %v1656_v27, %v3940_v17  ;;  %v1658_v54 = vpop.f32.mrb[126].mxu0  ;;  %2292 = vmatprep.mubr.bf16.mxu1 %v1756_v47 }
 0x1d8   :  { %v1659_v53 = vadd.f32 %v1658_v54, %v3934_v45  ;;  %v1660_v24 = vpop.f32.mrb[127].mxu0  ;;  %2293 = vmatmul.mubr.bf16.gmra.mrb[152].mxu1 %v1755_v3  ;;  %v1723_v48 = vmax.f32 %v1655_v20, 0.0 }
 0x1d9   :  { %v1020_v44 = vadd.f32 %v4044_v60, %v905_v35  ;;  %v908_v2 = vadd.f32 %v3936_v15, %v2811_v40  ;;  %v1661_v57 = vadd.f32 %v1660_v24, %v3940_v17  ;;  %1083 = vxpose.xlu0.b32.cont [6/16] %v1051_v31, 128  ;;  %v1724_v56 = vmax.f32 %v1657_v38, 0.0 }
 0x1da   :  { %v1725_v51 = vmax.f32 %v1659_v53, 0.0 }
 0x1db   :  { %v1052_v55 = vmax.f32 %v1020_v44, 0.0  ;;  %v1021_v7 = vadd.f32 %v4044_v60, %v908_v2  ;;  %v1726_v59 = vmax.f32 %v1661_v57, 0.0  ;;  %v2812_v62 = vpop.f32.mrb[48].mxu1 }
 0x1dc   :  { %v1757_v49 = vpack.c.bf16 %v1725_v51, %v1723_v48  ;;  %v2813_v1 = vpop.f32.mrb[49].mxu1 }
 0x1dd   :  { %v1758_v45 = vpack.c.bf16 %v1726_v59, %v1724_v56  ;;  %v2814_v4 = vadd.f32 %v2813_v1, %v2812_v62  ;;  %v2815_v12 = vpop.f32.mrb[50].mxu1  ;;  %1084 = vxpose.xlu0.b32.cont [7/16] %v1052_v55, 128  ;;  %v4077_v11 = vpop.f32.mrb[128].mxu0  ;;  %v1053_v17 = vmax.f32 %v1021_v7, 0.0 }
 0x1de   :  { %v2816_v15 = vpop.f32.mrb[51].mxu1  ;;  %v4079_v6 = vpop.f32.mrb[129].mxu0 }
 0x1df   :  { %v913_v19 = vadd.f32 %v2814_v4, %v3950_v30  ;;  %v2817_v14 = vadd.f32 %v2816_v15, %v2815_v12  ;;  %2300 = vmatprep.mubr.bf16.mxu1 %v1758_v45  ;;  %v4082_v3 = vpop.f32.mrb[130].mxu0 }
 0x1e0   :  { %2301 = vmatmul.mubr.bf16.gmra.mrb[156].mxu1 %v1757_v49  ;;  %v4084_v21 = vpop.f32.mrb[131].mxu0 }
 0x1e1   :  { %v1022_v47 = vadd.f32 %v4044_v60, %v913_v19  ;;  %v916_v22 = vadd.f32 %v2817_v14, %v3954_v36  ;;  %1085 = vxpose.xlu0.b32.cont [8/16] %v1053_v17, 128 }
 0x1e3   :  { %v1054_v25 = vmax.f32 %v1022_v47, 0.0  ;;  %v1023_v13 = vadd.f32 %v4044_v60, %v916_v22  ;;  %v2818_v20 = vpop.f32.mrb[52].mxu1  ;;  %v4113_v47 = vpop.permute.xlu1 %1165 }
 0x1e4   :  { %v2819_v50 = vpop.f32.mrb[53].mxu1 }
 0x1e5   :  { %v2820_v27 = vadd.f32 %v2819_v50, %v2818_v20  ;;  %v2821_v31 = vpop.f32.mrb[54].mxu1  ;;  %1086 = vxpose.xlu0.b32.cont [9/16] %v1054_v25, 128  ;;  %v4089_v30 = vpop.f32.mrb[132].mxu0  ;;  %v1055_v38 = vmax.f32 %v1023_v13, 0.0 }
 0x1e6   :  { %v2822_v35 = vpop.f32.mrb[55].mxu1  ;;  %v4091_v40 = vpop.f32.mrb[133].mxu0 }
 0x1e7   :  { %v921_v54 = vadd.f32 %v3947_v29, %v2820_v27  ;;  %v2823_v53 = vadd.f32 %v2822_v35, %v2821_v31  ;;  %v4094_v24 = vpop.f32.mrb[134].mxu0 }
 0x1e8   :  { %v4096_v36 = vpop.f32.mrb[135].mxu0 }
 0x1e9   :  { %v1024_v44 = vadd.f32 %v4044_v60, %v921_v54  ;;  %v924_v2 = vadd.f32 %v3952_v33, %v2823_v53  ;;  %1087 = vxpose.xlu0.b32.cont [10/16] %v1055_v38, 128 }
 0x1eb   :  { %v1056_v57 = vmax.f32 %v1024_v44, 0.0  ;;  %v1025_v48 = vadd.f32 %v4044_v60, %v924_v2  ;;  %v2824_v51 = vpop.f32.mrb[56].mxu1 }
 0x1ec   :  { %v2825_v55 = vpop.f32.mrb[57].mxu1 }
 0x1ed   :  { %v2826_v7 = vadd.f32 %v2825_v55, %v2824_v51  ;;  %v2827_v56 = vpop.f32.mrb[58].mxu1  ;;  %1088 = vxpose.xlu0.b32.cont [11/16] %v1056_v57, 128  ;;  %v4101_v59 = vpop.f32.mrb[136].mxu0  ;;  %v1057_v49 = vmax.f32 %v1025_v48, 0.0 }
 0x1ee   :  { %v2828_v29 = vpop.f32.mrb[59].mxu1  ;;  %v4103_v62 = vpop.f32.mrb[137].mxu0 }
 0x1ef   :  { %v929_v1 = vadd.f32 %v2826_v7, %v3962_v46  ;;  %v2829_v45 = vadd.f32 %v2828_v29, %v2827_v56  ;;  %v4106_v4 = vpop.f32.mrb[138].mxu0  ;;  %v4127_v48 = vpop.permute.xlu1 %1175 }
 0x1f0   :  { %v4108_v33 = vpop.f32.mrb[139].mxu0 }
 0x1f1   :  { %v1026_v12 = vadd.f32 %v4044_v60, %v929_v1  ;;  %v932_v15 = vadd.f32 %v2829_v45, %v3966_v58  ;;  %1089 = vxpose.xlu0.b32.cont [12/16] %v1057_v49, 128 }
 0x1f3   :  { %v1058_v17 = vmax.f32 %v1026_v12, 0.0  ;;  %v1027_v19 = vadd.f32 %v4044_v60, %v932_v15  ;;  %v2830_v14 = vpop.f32.mrb[60].mxu1 }
 0x1f4   :  { %v2831_v22 = vpop.f32.mrb[61].mxu1 }
 0x1f5   :  { %v2832_v25 = vadd.f32 %v2831_v22, %v2830_v14  ;;  %v2833_v13 = vpop.f32.mrb[62].mxu1  ;;  %1090 = vxpose.xlu0.b32.cont [13/16] %v1058_v17, 128  ;;  %v4115_v46 = vpop.f32.mrb[140].mxu0  ;;  %v1059_v27 = vmax.f32 %v1027_v19, 0.0 }
 0x1f6   :  { %v2834_v20 = vpop.f32.mrb[63].mxu1  ;;  %v4117_v50 = vpop.f32.mrb[141].mxu0 }
 0x1f7   :  { %v937_v31 = vadd.f32 %v3959_v43, %v2832_v25  ;;  %v2835_v58 = vadd.f32 %v2834_v20, %v2833_v13  ;;  %v4120_v35 = vpop.f32.mrb[142].mxu0  ;;  %v4140_v19 = vpop.permute.xlu1 %1185 }
 0x1f8   :  { %v4122_v38 = vpop.f32.mrb[143].mxu0 }
 0x1f9   :  { %v1028_v54 = vadd.f32 %v4044_v60, %v937_v31  ;;  %v940_v53 = vadd.f32 %v3964_v52, %v2835_v58  ;;  %1091 = vxpose.xlu0.b32.cont [14/16] %v1059_v27, 128 }
 0x1fb   :  { %v1060_v44 = vmax.f32 %v1028_v54, 0.0  ;;  %v1029_v2 = vadd.f32 %v4044_v60, %v940_v53  ;;  %v2836_v57 = vpop.f32.mrb[64].mxu1  ;;  %v4144_v53 = vpop.permute.xlu1 %1195 }
 0x1fc   :  { %v2837_v51 = vpop.f32.mrb[65].mxu1 }
 0x1fd   :  { %v2838_v55 = vadd.f32 %v2837_v51, %v2836_v57  ;;  %v2839_v7 = vpop.f32.mrb[66].mxu1  ;;  %1092 = vxpose.xlu0.b32.cont [15/16] %v1060_v44, 128  ;;  %v4129_v43 = vpop.f32.mrb[144].mxu0  ;;  %v1061_v49 = vmax.f32 %v1029_v2, 0.0 }
 0x1fe   :  { %v2840_v56 = vpop.f32.mrb[67].mxu1  ;;  %v4131_v29 = vpop.f32.mrb[145].mxu0 }
 0x1ff   :  { %v945_v1 = vadd.f32 %v2838_v55, %v3974_v8  ;;  %v2841_v52 = vadd.f32 %v2840_v56, %v2839_v7  ;;  %v4134_v45 = vpop.f32.mrb[146].mxu0 }
 0x200   :  { %v4136_v12 = vpop.f32.mrb[147].mxu0 }
 0x201   :  { %v1030_v15 = vadd.f32 %v4044_v60, %v945_v1  ;;  %v948_v17 = vadd.f32 %v2841_v52, %v3978_v18  ;;  %1093 = vxpose.xlu0.b32.end [16/16] %v1061_v49, 128 }
 0x203   :  { %v1062_v14 = vmax.f32 %v1030_v15, 0.0  ;;  %v1031_v22 = vadd.f32 %v4044_v60, %v948_v17  ;;  %v2842_v25 = vpop.f32.mrb[68].mxu1  ;;  %v4157_v15 = vpop.permute.xlu1 %1205 }
 0x204   :  { %v2843_v13 = vpop.f32.mrb[69].mxu1 }
 0x205   :  { %v2844_v20 = vadd.f32 %v2843_v13, %v2842_v25  ;;  %v2845_v27 = vpop.f32.mrb[70].mxu1  ;;  %1110 = vxpose.xlu1.b32.start [1/16] %v1062_v14, 128  ;;  %v1063_v31 = vmax.f32 %v1031_v22, 0.0  ;;  %v4148_v2 = vpop.f32.mrb[148].mxu0 }
 0x206   :  { %v2846_v8 = vpop.f32.mrb[71].mxu1  ;;  %v4151_v7 = vpop.f32.mrb[149].mxu0 }
 0x207   :  { %v953_v58 = vadd.f32 %v3971_v0, %v2844_v20  ;;  %v2847_v54 = vadd.f32 %v2846_v8, %v2845_v27  ;;  %v4153_v49 = vpop.f32.mrb[150].mxu0 }
 0x208   :  { %v4155_v52 = vpop.f32.mrb[151].mxu0 }
 0x209   :  { %v1032_v18 = vadd.f32 %v4044_v60, %v953_v58  ;;  %v956_v44 = vadd.f32 %v3976_v34, %v2847_v54  ;;  %1111 = vxpose.xlu1.b32.cont [2/16] %v1063_v31, 128  ;;  %v4163_v31 = vpop.permute.xlu1 %1215 }
 0x20b   :  { %v1064_v57 = vmax.f32 %v1032_v18, 0.0  ;;  %v1033_v51 = vadd.f32 %v4044_v60, %v956_v44  ;;  %v2848_v55 = vpop.f32.mrb[72].mxu1 }
 0x20c   :  { %v2849_v56 = vpop.f32.mrb[73].mxu1 }
 0x20d   :  { %v2850_v0 = vadd.f32 %v2849_v56, %v2848_v55  ;;  %v2851_v1 = vpop.f32.mrb[74].mxu1  ;;  %1112 = vxpose.xlu1.b32.cont [3/16] %v1064_v57, 128  ;;  %v1065_v17 = vmax.f32 %v1033_v51, 0.0  ;;  %v4168_v56 = vpop.permute.xlu1 %1225 }
 0x20e   :  { %v2852_v34 = vpop.f32.mrb[75].mxu1 }
 0x20f   :  { %v961_v14 = vadd.f32 %v2850_v0, %v3986_v23  ;;  %v2853_v22 = vadd.f32 %v2852_v34, %v2851_v1  ;;  %v4170_v0 = vpop.f32.mrb[152].mxu0 }
 0x211   :  { %v1034_v25 = vadd.f32 %v4044_v60, %v961_v14  ;;  %v964_v13 = vadd.f32 %v2853_v22, %v3990_v42  ;;  %1113 = vxpose.xlu1.b32.cont [4/16] %v1065_v17, 128  ;;  %v4173_v14 = vpop.f32.mrb[153].mxu0 }
 0x213   :  { %v1066_v20 = vmax.f32 %v1034_v25, 0.0  ;;  %v1035_v27 = vadd.f32 %v4044_v60, %v964_v13  ;;  %v2854_v8 = vpop.f32.mrb[76].mxu1  ;;  %v4175_v25 = vpop.f32.mrb[154].mxu0 }
 0x214   :  { %v2855_v58 = vpop.f32.mrb[77].mxu1 }
 0x215   :  { %v2856_v54 = vadd.f32 %v2855_v58, %v2854_v8  ;;  %v2857_v18 = vpop.f32.mrb[78].mxu1  ;;  %1114 = vxpose.xlu1.b32.cont [5/16] %v1066_v20, 128  ;;  %v1067_v57 = vmax.f32 %v1035_v27, 0.0  ;;  %v4177_v20 = vpop.f32.mrb[155].mxu0 }
 0x216   :  { %v2858_v44 = vpop.f32.mrb[79].mxu1 }
 0x217   :  { %v969_v23 = vadd.f32 %v3983_v32, %v2856_v54  ;;  %v2859_v51 = vadd.f32 %v2858_v44, %v2857_v18  ;;  %v4182_v44 = vpop.permute.xlu1 %1235 }
 0x219   :  { %v1036_v55 = vadd.f32 %v4044_v60, %v969_v23  ;;  %v972_v42 = vadd.f32 %v3988_v41, %v2859_v51  ;;  %1115 = vxpose.xlu1.b32.cont [6/16] %v1067_v57, 128 }
 0x21b   :  { %v1068_v1 = vmax.f32 %v1036_v55, 0.0  ;;  %v1037_v34 = vadd.f32 %v4044_v60, %v972_v42  ;;  %v2860_v17 = vpop.f32.mrb[80].mxu1  ;;  %v4185_v42 = vpop.permute.xlu0 %1160 }
 0x21c   :  { %v2861_v22 = vpop.f32.mrb[81].mxu1 }
 0x21d   :  { %v2862_v32 = vadd.f32 %v2861_v22, %v2860_v17  ;;  %v2863_v13 = vpop.f32.mrb[82].mxu1  ;;  %1116 = vxpose.xlu1.b32.cont [7/16] %v1068_v1, 128  ;;  %v1069_v27 = vmax.f32 %v1037_v34, 0.0 }
 0x21e   :  { %v2864_v41 = vpop.f32.mrb[83].mxu1 }
 0x21f   :  { %v977_v8 = vadd.f32 %v2862_v32, %v3998_v61  ;;  %v2865_v58 = vadd.f32 %v2864_v41, %v2863_v13  ;;  %v4188_v13 = vpop.permute.xlu1 %2462 }
 0x220   :  { %4501 = vst [vmem:[#allocation7_spill] sm:$0xff] %v4188_v13 }
 0x221   :  { %v1038_v54 = vadd.f32 %v4044_v60, %v977_v8  ;;  %v980_v18 = vadd.f32 %v2865_v58, %v4002_v5  ;;  %1117 = vxpose.xlu1.b32.cont [8/16] %v1069_v27, 128  ;;  %v4192_v27 = vpop.permute.xlu0 %1170  ;;  %v4194_v8 = vpop.f32.mrb[156].mxu0 }
 0x223   :  { %v1070_v57 = vmax.f32 %v1038_v54, 0.0  ;;  %v1039_v23 = vadd.f32 %v4044_v60, %v980_v18  ;;  %v2866_v51 = vpop.f32.mrb[84].mxu1 }
 0x224   :  { %v2867_v55 = vpop.f32.mrb[85].mxu1 }
 0x225   :  { %v2868_v1 = vadd.f32 %v2867_v55, %v2866_v51  ;;  %v2869_v17 = vpop.f32.mrb[86].mxu1  ;;  %1118 = vxpose.xlu1.b32.cont [9/16] %v1070_v57, 128  ;;  %v1071_v61 = vmax.f32 %v1039_v23, 0.0  ;;  %v4197_v57 = vpop.f32.mrb[157].mxu0 }
 0x226   :  { %v2870_v34 = vpop.f32.mrb[87].mxu1 }
 0x227   :  { %v985_v22 = vadd.f32 %v3995_v37, %v2868_v1  ;;  %v2871_v32 = vadd.f32 %v2870_v34, %v2869_v17  ;;  %v4199_v37 = vpop.f32.mrb[158].mxu0 }
 0x228   :  { %v4201_v1 = vpop.f32.mrb[159].mxu0 }
 0x229   :  { %v1040_v5 = vadd.f32 %v4044_v60, %v985_v22  ;;  %v988_v41 = vadd.f32 %v4000_v63, %v2871_v32  ;;  %1119 = vxpose.xlu1.b32.cont [10/16] %v1071_v61, 128  ;;  %v4204_v22 = vpop.permute.xlu0 %1180 }
 0x22b   :  { %v1072_v58 = vmax.f32 %v1040_v5, 0.0  ;;  %v1041_v54 = vadd.f32 %v4044_v60, %v988_v41  ;;  %v2872_v18 = vpop.f32.mrb[88].mxu1  ;;  %v4208_v41 = vpop.permute.xlu1 %2467 }
 0x22c   :  { %v2873_v23 = vpop.f32.mrb[89].mxu1  ;;  %4502 = vst [vmem:[#allocation8_spill] sm:$0xff] %v4208_v41 }
 0x22d   :  { %v2874_v51 = vadd.f32 %v2873_v23, %v2872_v18  ;;  %v2875_v55 = vpop.f32.mrb[90].mxu1  ;;  %1120 = vxpose.xlu1.b32.cont [11/16] %v1072_v58, 128  ;;  %v1073_v17 = vmax.f32 %v1041_v54, 0.0  ;;  %v4211_v54 = vpop.permute.xlu0 %1190 }
 0x22e   :  { %v2876_v63 = vpop.f32.mrb[91].mxu1 }
 0x22f   :  { %v993_v34 = vadd.f32 %v2874_v51, %v4010_v16  ;;  %v2877_v61 = vadd.f32 %v2876_v63, %v2875_v55 }
 0x231   :  { %v1042_v32 = vadd.f32 %v4044_v60, %v993_v34  ;;  %v996_v5 = vadd.f32 %v2877_v61, %v4014_v28  ;;  %1121 = vxpose.xlu1.b32.cont [12/16] %v1073_v17, 128  ;;  %v4214_v34 = vpop.permute.xlu1 %2472 }
 0x233   :  { %v1074_v9 = vmax.f32 %v1042_v32, 0.0  ;;  %v1043_v18 = vadd.f32 %v4044_v60, %v996_v5  ;;  %v2878_v58 = vpop.f32.mrb[92].mxu1 }
 0x234   :  { %v2879_v23 = vpop.f32.mrb[93].mxu1 }
 0x235   :  { %v2880_v13 = vadd.f32 %v2879_v23, %v2878_v58  ;;  %v2881_v10 = vpop.f32.mrb[94].mxu1  ;;  %1122 = vxpose.xlu1.b32.cont [13/16] %v1074_v9, 128  ;;  %v1075_v51 = vmax.f32 %v1043_v18, 0.0  ;;  %v4219_v58 = vpop.permute.xlu0 %1200 }
 0x236   :  { %v2882_v16 = vpop.f32.mrb[95].mxu1 }
 0x237   :  { %v1001_v55 = vadd.f32 %v4007_v26, %v2880_v13  ;;  %v2883_v63 = vadd.f32 %v2882_v16, %v2881_v10  ;;  %v4221_v26 = vpop.permute.xlu1 %2477 }
 0x238   :  { %4503 = vst [vmem:[#allocation9_spill] sm:$0xff] %v4221_v26 }
 0x239   :  { %v1044_v28 = vadd.f32 %v4044_v60, %v1001_v55  ;;  %v1004_v17 = vadd.f32 %v4012_v39, %v2883_v63  ;;  %1123 = vxpose.xlu1.b32.cont [14/16] %v1075_v51, 128  ;;  %v4226_v55 = vpop.permute.xlu0 %1210 }
 0x23b   :  { %v1076_v61 = vmax.f32 %v1044_v28, 0.0  ;;  %v1045_v32 = vadd.f32 %v4044_v60, %v1004_v17  ;;  %v2917_v5 = vpop.f32.mrb[96].mxu1 }
 0x23c   :  { %v2918_v9 = vpop.f32.mrb[97].mxu1 }
 0x23d   :  { %v2919_v23 = vadd.f32 %v2918_v9, %v2917_v5  ;;  %v2920_v41 = vpop.f32.mrb[98].mxu1  ;;  %1124 = vxpose.xlu1.b32.cont [15/16] %v1076_v61, 128  ;;  %v1077_v10 = vmax.f32 %v1045_v32, 0.0  ;;  %v4229_v61 = vpop.permute.xlu1 %2482 }
 0x23e   :  { %v2921_v18 = vpop.f32.mrb[99].mxu1 }
 0x23f   :  { %v2183_v13 = vadd.f32 %v2919_v23, %v4079_v6  ;;  %v2922_v16 = vadd.f32 %v2921_v18, %v2920_v41  ;;  %v4232_v18 = vpop.permute.xlu0 %1220 }
 0x241   :  { %v2316_v39 = vadd.f32 %v4044_v60, %v2183_v13  ;;  %v2186_v51 = vadd.f32 %v2922_v16, %v4084_v21  ;;  %1125 = vxpose.xlu1.b32.end [16/16] %v1077_v10, 128  ;;  %v4236_v13 = vpop.permute.xlu1 %2487 }
 0x242   :  { %4504 = vst [vmem:[#allocation10_spill] sm:$0xff] %v4236_v13 }
 0x243   :  { %v2348_v63 = vmax.f32 %v2316_v39, 0.0  ;;  %v2317_v28 = vadd.f32 %v4044_v60, %v2186_v51  ;;  %v2923_v17 = vpop.f32.mrb[100].mxu1 }
 0x244   :  { %v2924_v5 = vpop.f32.mrb[101].mxu1 }
 0x245   :  { %v2925_v9 = vadd.f32 %v2924_v5, %v2923_v17  ;;  %v2926_v26 = vpop.f32.mrb[102].mxu1  ;;  %2380 = vxpose.xlu0.b32.start [1/16] %v2348_v63, 128  ;;  %v2349_v6 = vmax.f32 %v2317_v28, 0.0  ;;  %v4239_v28 = vpop.permute.xlu0 %1230 }
 0x246   :  { %v2927_v32 = vpop.f32.mrb[103].mxu1 }
 0x247   :  { %v2191_v41 = vadd.f32 %v4077_v11, %v2925_v9  ;;  %v2928_v23 = vadd.f32 %v2927_v32, %v2926_v26 }
 0x249   :  { %v2318_v21 = vadd.f32 %v4044_v60, %v2191_v41  ;;  %v2194_v10 = vadd.f32 %v4082_v3, %v2928_v23  ;;  %2381 = vxpose.xlu0.b32.cont [2/16] %v2349_v6, 128  ;;  %v4242_v41 = vpop.permute.xlu1 %2492 }
 0x24b   :  { %v2350_v16 = vmax.f32 %v2318_v21, 0.0  ;;  %v2319_v39 = vadd.f32 %v4044_v60, %v2194_v10  ;;  %v2929_v51 = vpop.f32.mrb[104].mxu1 }
 0x24c   :  { %v2930_v17 = vpop.f32.mrb[105].mxu1 }
 0x24d   :  { %v2931_v63 = vadd.f32 %v2930_v17, %v2929_v51  ;;  %v2932_v5 = vpop.f32.mrb[106].mxu1  ;;  %2382 = vxpose.xlu0.b32.cont [3/16] %v2350_v16, 128  ;;  %v2351_v26 = vmax.f32 %v2319_v39, 0.0  ;;  %v4247_v51 = vpop.trf.xlu0 }
 0x24e   :  { %v2933_v11 = vpop.f32.mrb[107].mxu1 }
 0x24f   :  { %v2199_v9 = vadd.f32 %v2931_v63, %v4091_v40  ;;  %v2934_v32 = vadd.f32 %v2933_v11, %v2932_v5  ;;  %v4249_v40 = vpop.permute.xlu1 %2497 }
 0x250   :  { %4505 = vst [vmem:[#allocation11_spill] sm:$0xff] %v4249_v40 }
 0x251   :  { %v2320_v3 = vadd.f32 %v4044_v60, %v2199_v9  ;;  %v2202_v6 = vadd.f32 %v2934_v32, %v4096_v36  ;;  %2383 = vxpose.xlu0.b32.cont [4/16] %v2351_v26, 128  ;;  %v4254_v9 = vpop.trf.xlu0 }
 0x253   :  { %v2352_v23 = vmax.f32 %v2320_v3, 0.0  ;;  %v2321_v21 = vadd.f32 %v4044_v60, %v2202_v6  ;;  %v2935_v10 = vpop.f32.mrb[108].mxu1 }
 0x254   :  { %v2936_v16 = vpop.f32.mrb[109].mxu1 }
 0x255   :  { %v2937_v17 = vadd.f32 %v2936_v16, %v2935_v10  ;;  %v2938_v13 = vpop.f32.mrb[110].mxu1  ;;  %2384 = vxpose.xlu0.b32.cont [5/16] %v2352_v23, 128  ;;  %v2353_v63 = vmax.f32 %v2321_v21, 0.0  ;;  %v4257_v23 = vpop.permute.xlu1 %2502 }
 0x256   :  { %v2939_v39 = vpop.f32.mrb[111].mxu1 }
 0x257   :  { %v2207_v5 = vadd.f32 %v4089_v30, %v2937_v17  ;;  %v2940_v11 = vadd.f32 %v2939_v39, %v2938_v13  ;;  %v4260_v39 = vpop.trf.xlu0 }
 0x259   :  { %v2322_v36 = vadd.f32 %v4044_v60, %v2207_v5  ;;  %v2210_v26 = vadd.f32 %v4094_v24, %v2940_v11  ;;  %2385 = vxpose.xlu0.b32.cont [6/16] %v2353_v63, 128  ;;  %v4264_v5 = vpop.permute.xlu1 %2507 }
 0x25a   :  { %4506 = vst [vmem:[#allocation12_spill] sm:$0xff] %v4264_v5 }
 0x25b   :  { %v2354_v32 = vmax.f32 %v2322_v36, 0.0  ;;  %v2323_v3 = vadd.f32 %v4044_v60, %v2210_v26  ;;  %v2941_v6 = vpop.f32.mrb[112].mxu1 }
 0x25c   :  { %v2942_v10 = vpop.f32.mrb[113].mxu1 }
 0x25d   :  { %v2943_v16 = vadd.f32 %v2942_v10, %v2941_v6  ;;  %v2944_v40 = vpop.f32.mrb[114].mxu1  ;;  %2386 = vxpose.xlu0.b32.cont [7/16] %v2354_v32, 128  ;;  %v2355_v30 = vmax.f32 %v2323_v3, 0.0  ;;  %v4267_v3 = vpop.trf.xlu0 }
 0x25e   :  { %v2945_v21 = vpop.f32.mrb[115].mxu1 }
 0x25f   :  { %v2215_v13 = vadd.f32 %v2943_v16, %v4103_v62  ;;  %v2946_v17 = vadd.f32 %v2945_v21, %v2944_v40 }
 0x261   :  { %v2324_v24 = vadd.f32 %v4044_v60, %v2215_v13  ;;  %v2218_v63 = vadd.f32 %v2946_v17, %v4108_v33  ;;  %2387 = vxpose.xlu0.b32.cont [8/16] %v2355_v30, 128  ;;  %v4270_v13 = vpop.permute.xlu1 %2512 }
 0x263   :  { %v2356_v11 = vmax.f32 %v2324_v24, 0.0  ;;  %v2325_v36 = vadd.f32 %v4044_v60, %v2218_v63  ;;  %v2947_v26 = vpop.f32.mrb[116].mxu1 }
 0x264   :  { %v2948_v6 = vpop.f32.mrb[117].mxu1 }
 0x265   :  { %v2949_v32 = vadd.f32 %v2948_v6, %v2947_v26  ;;  %v2950_v10 = vpop.f32.mrb[118].mxu1  ;;  %2388 = vxpose.xlu0.b32.cont [9/16] %v2356_v11, 128  ;;  %v2357_v40 = vmax.f32 %v2325_v36, 0.0  ;;  %v4275_v26 = vpop.trf.xlu0 }
 0x266   :  { %v2951_v62 = vpop.f32.mrb[119].mxu1 }
 0x267   :  { %v2223_v16 = vadd.f32 %v4101_v59, %v2949_v32  ;;  %v2952_v21 = vadd.f32 %v2951_v62, %v2950_v10  ;;  %v4277_v59 = vpop.permute.xlu1 %2517 }
 0x268   :  { %4507 = vst [vmem:[#allocation13_spill] sm:$0xff] %v4277_v59 }
 0x269   :  { %v2326_v33 = vadd.f32 %v4044_v60, %v2223_v16  ;;  %v2226_v30 = vadd.f32 %v4106_v4, %v2952_v21  ;;  %2389 = vxpose.xlu0.b32.cont [10/16] %v2357_v40, 128  ;;  %v4282_v16 = vpop.trf.xlu0 }
 0x26b   :  { %v2358_v17 = vmax.f32 %v2326_v33, 0.0  ;;  %v2327_v24 = vadd.f32 %v4044_v60, %v2226_v30  ;;  %v2953_v63 = vpop.f32.mrb[120].mxu1 }
 0x26c   :  { %v2954_v11 = vpop.f32.mrb[121].mxu1 }
 0x26d   :  { %v2955_v6 = vadd.f32 %v2954_v11, %v2953_v63  ;;  %v2956_v5 = vpop.f32.mrb[122].mxu1  ;;  %2390 = vxpose.xlu0.b32.cont [11/16] %v2358_v17, 128  ;;  %v2359_v32 = vmax.f32 %v2327_v24, 0.0  ;;  %v4285_v17 = vpop.permute.xlu1 %2522 }
 0x26e   :  { %v2957_v36 = vpop.f32.mrb[123].mxu1  ;;  %4508 = vst [vmem:[#allocation14_spill] sm:$0xff] %v4285_v17 }
 0x26f   :  { %v2231_v10 = vadd.f32 %v2955_v6, %v4117_v50  ;;  %v2958_v62 = vadd.f32 %v2957_v36, %v2956_v5  ;;  %v4288_v36 = vpop.trf.xlu0 }
 0x271   :  { %v2328_v4 = vadd.f32 %v4044_v60, %v2231_v10  ;;  %v2234_v40 = vadd.f32 %v2958_v62, %v4122_v38  ;;  %2391 = vxpose.xlu0.b32.cont [12/16] %v2359_v32, 128  ;;  %v4292_v10 = vpop.permute.xlu1 %2527 }
 0x272   :  { %4509 = vst [vmem:[#allocation15_spill] sm:$0xff] %v4292_v10 }
 0x273   :  { %v2360_v21 = vmax.f32 %v2328_v4, 0.0  ;;  %v2329_v33 = vadd.f32 %v4044_v60, %v2234_v40  ;;  %v2959_v30 = vpop.f32.mrb[124].mxu1 }
 0x274   :  { %v2960_v63 = vpop.f32.mrb[125].mxu1 }
 0x275   :  { %v2961_v11 = vadd.f32 %v2960_v63, %v2959_v30  ;;  %v2962_v59 = vpop.f32.mrb[126].mxu1  ;;  %2392 = vxpose.xlu0.b32.cont [13/16] %v2360_v21, 128  ;;  %v2361_v50 = vmax.f32 %v2329_v33, 0.0  ;;  %v4295_v33 = vpop.trf.xlu0 }
 0x276   :  { %v2963_v24 = vpop.f32.mrb[127].mxu1 }
 0x277   :  { %v2239_v5 = vadd.f32 %v4115_v46, %v2961_v11  ;;  %v2964_v6 = vadd.f32 %v2963_v24, %v2962_v59 }
 0x279   :  { %v2330_v38 = vadd.f32 %v4044_v60, %v2239_v5  ;;  %v2242_v32 = vadd.f32 %v4120_v35, %v2964_v6  ;;  %2393 = vxpose.xlu0.b32.cont [14/16] %v2361_v50, 128  ;;  %v4298_v5 = vpop.permute.xlu1 %2532 }
 0x27a   :  { %4510 = vst [vmem:[#allocation16_spill] sm:$0xff] %v4298_v5 }
 0x27b   :  { %v2362_v62 = vmax.f32 %v2330_v38, 0.0  ;;  %v2331_v4 = vadd.f32 %v4044_v60, %v2242_v32  ;;  %v2965_v40 = vpop.f32.mrb[128].mxu1 }
 0x27c   :  { %v2966_v30 = vpop.f32.mrb[129].mxu1 }
 0x27d   :  { %v2967_v21 = vadd.f32 %v2966_v30, %v2965_v40  ;;  %v2968_v63 = vpop.f32.mrb[130].mxu1  ;;  %2394 = vxpose.xlu0.b32.cont [15/16] %v2362_v62, 128  ;;  %v2363_v59 = vmax.f32 %v2331_v4, 0.0  ;;  %v4303_v40 = vpop.trf.xlu0 }
 0x27e   :  { %v2969_v46 = vpop.f32.mrb[131].mxu1 }
 0x27f   :  { %v2247_v11 = vadd.f32 %v2967_v21, %v4131_v29  ;;  %v2970_v24 = vadd.f32 %v2969_v46, %v2968_v63 }
 0x281   :  { %v2332_v35 = vadd.f32 %v4044_v60, %v2247_v11  ;;  %v2250_v50 = vadd.f32 %v2970_v24, %v4136_v12  ;;  %2395 = vxpose.xlu0.b32.end [16/16] %v2363_v59, 128  ;;  %v4312_v24 = vpop.trf.xlu0 }
 0x283   :  { %v2364_v6 = vmax.f32 %v2332_v35, 0.0  ;;  %v2333_v38 = vadd.f32 %v4044_v60, %v2250_v50  ;;  %v2971_v32 = vpop.f32.mrb[132].mxu1 }
 0x284   :  { %v2972_v62 = vpop.f32.mrb[133].mxu1 }
 0x285   :  { %v2973_v30 = vadd.f32 %v2972_v62, %v2971_v32  ;;  %v2974_v10 = vpop.f32.mrb[134].mxu1  ;;  %2412 = vxpose.xlu1.b32.start [1/16] %v2364_v6, 128  ;;  %v4305_v4 = vpop.trf.xlu1  ;;  %v2365_v21 = vmax.f32 %v2333_v38, 0.0 }
 0x286   :  { %v2975_v29 = vpop.f32.mrb[135].mxu1 }
 0x287   :  { %v2255_v63 = vadd.f32 %v4129_v43, %v2973_v30  ;;  %v2976_v46 = vadd.f32 %v2975_v29, %v2974_v10  ;;  %v4318_v29 = vpop.trf.xlu0 }
 0x289   :  { %v2334_v12 = vadd.f32 %v4044_v60, %v2255_v63  ;;  %v2258_v59 = vadd.f32 %v4134_v45, %v2976_v46  ;;  %2413 = vxpose.xlu1.b32.cont [2/16] %v2365_v21, 128  ;;  %v4310_v11 = vpop.trf.xlu1 }
 0x28b   :  { %v2366_v35 = vmax.f32 %v2334_v12, 0.0  ;;  %v2335_v50 = vadd.f32 %v4044_v60, %v2258_v59  ;;  %v2977_v6 = vpop.f32.mrb[136].mxu1  ;;  %v4327_v59 = vld [vmem:[%s4484_s5] ss:$0 sm:$0xff] }
 0x28c   :  { %v2978_v32 = vpop.f32.mrb[137].mxu1 }
 0x28d   :  { %v2979_v62 = vadd.f32 %v2978_v32, %v2977_v6  ;;  %v2980_v5 = vpop.f32.mrb[138].mxu1  ;;  %2414 = vxpose.xlu1.b32.cont [3/16] %v2366_v35, 128  ;;  %v4315_v38 = vpop.trf.xlu1  ;;  %v2367_v10 = vmax.f32 %v2335_v50, 0.0 }
 0x28e   :  { %v2981_v43 = vpop.f32.mrb[139].mxu1 }
 0x28f   :  { %v2263_v30 = vadd.f32 %v2979_v62, %v4151_v7  ;;  %v2982_v45 = vadd.f32 %v2981_v43, %v2980_v5  ;;  %v4336_v62 = vpop.trf.xlu0 }
 0x291   :  { %v2336_v21 = vadd.f32 %v4044_v60, %v2263_v30  ;;  %v2266_v63 = vadd.f32 %v2982_v45, %v4155_v52  ;;  %2415 = vxpose.xlu1.b32.cont [4/16] %v2367_v10, 128  ;;  %v4322_v46 = vpop.trf.xlu1  ;;  %v1238_v60 = vmul.f32 %v4185_v42, %v4247_v51  ;;  %v1240_v52 = vmul.f32 %v4113_v47, %v4254_v9 }
 0x292   :  { %v1244_v9 = vmul.f32 %v4127_v48, %v4267_v3 }
 0x293   :  { %v2368_v12 = vmax.f32 %v2336_v21, 0.0  ;;  %v2337_v35 = vadd.f32 %v4327_v59, %v2266_v63  ;;  %v2983_v50 = vpop.f32.mrb[140].mxu1  ;;  %v1242_v21 = vmul.f32 %v4192_v27, %v4260_v39  ;;  %v1270_v51 = vadd.f32 %v1240_v52, %v1238_v60  ;;  %v1106_v39 = vpop.trf.xlu0 }
 0x294   :  { %v2984_v7 = vpop.f32.mrb[141].mxu1  ;;  %v1248_v60 = vmul.f32 %v4140_v19, %v4282_v16 }
 0x295   :  { %v2985_v5 = vadd.f32 %v2984_v7, %v2983_v50  ;;  %v2986_v6 = vpop.f32.mrb[142].mxu1  ;;  %2416 = vxpose.xlu1.b32.cont [5/16] %v2368_v12, 128  ;;  %v4330_v32 = vpop.trf.xlu1  ;;  %v2369_v10 = vmax.f32 %v2337_v35, 0.0 }
 0x296   :  { %v2987_v43 = vpop.f32.mrb[143].mxu1 }
 0x297   :  { %v2271_v30 = vadd.f32 %v4148_v2, %v2985_v5  ;;  %v2988_v45 = vadd.f32 %v2987_v43, %v2986_v6  ;;  %v1271_v2 = vadd.f32 %v1270_v51, %v1242_v21  ;;  %v1246_v5 = vmul.f32 %v4204_v22, %v4275_v26  ;;  %v1107_v16 = vpop.trf.xlu0 }
 0x298   :  { %v1250_v26 = vmul.f32 %v4211_v54, %v4288_v36  ;;  %v1241_v36 = vmul.f32 %v4113_v47, %v4310_v11  ;;  %v2459_v11 = vld [vmem:[%s4485_s6 + $0x78] sm:$0xff] }
 0x299   :  { %v2338_v63 = vadd.f32 %v4327_v59, %v2271_v30  ;;  %v2274_v12 = vadd.f32 %v4153_v49, %v2988_v45  ;;  %2417 = vxpose.xlu1.b32.cont [6/16] %v2369_v10, 128  ;;  %v4343_v50 = vpop.trf.xlu1  ;;  %v1272_v10 = vadd.f32 %v1271_v2, %v1244_v9  ;;  %v1252_v9 = vmul.f32 %v4144_v53, %v4295_v33 }
 0x29a   :  { %v1256_v33 = vmul.f32 %v4157_v15, %v4312_v24 }
 0x29b   :  { %v2370_v7 = vmax.f32 %v2338_v63, 0.0  ;;  %v2339_v35 = vadd.f32 %v4327_v59, %v2274_v12  ;;  %v2989_v17 = vpop.f32.mrb[144].mxu1  ;;  %v1273_v21 = vadd.f32 %v1272_v10, %v1246_v5  ;;  %v1254_v5 = vmul.f32 %v4219_v58, %v4303_v40 }
 0x29c   :  { %v2990_v6 = vpop.f32.mrb[145].mxu1 }
 0x29d   :  { %v2991_v43 = vadd.f32 %v2990_v6, %v2989_v17  ;;  %v2992_v30 = vpop.f32.mrb[146].mxu1  ;;  %2418 = vxpose.xlu1.b32.cont [7/16] %v2370_v7, 128  ;;  %v4350_v49 = vpop.trf.xlu1  ;;  %v2371_v52 = vmax.f32 %v2339_v35, 0.0  ;;  %v1274_v7 = vadd.f32 %v1273_v21, %v1248_v60 }
 0x29e   :  { %v2993_v3 = vpop.f32.mrb[147].mxu1 }
 0x29f   :  { %v2279_v45 = vadd.f32 %v2991_v43, %v4173_v14  ;;  %v2994_v63 = vadd.f32 %v2993_v3, %v2992_v30  ;;  %v1275_v6 = vadd.f32 %v1274_v7, %v1250_v26  ;;  %v1239_v3 = vmul.f32 %v4185_v42, %v4305_v4  ;;  %v1108_v4 = vpop.trf.xlu0 }
 0x2a0   :  { %v1258_v26 = vmul.f32 %v4226_v55, %v4318_v29  ;;  %v1245_v42 = vmul.f32 %v4127_v48, %v4322_v46 }
 0x2a1   :  { %v2340_v12 = vadd.f32 %v4327_v59, %v2279_v45  ;;  %v2282_v17 = vadd.f32 %v2994_v63, %v4177_v20  ;;  %2419 = vxpose.xlu1.b32.cont [8/16] %v2371_v52, 128  ;;  %v1133_v51 = vpop.trf.xlu1  ;;  %v1276_v60 = vadd.f32 %v1275_v6, %v1252_v9  ;;  %v1243_v52 = vmul.f32 %v4192_v27, %v4315_v38 }
 0x2a2   :  { %v1291_v24 = vadd.f32 %v1241_v36, %v1239_v3  ;;  %v1247_v9 = vmul.f32 %v4204_v22, %v4330_v32  ;;  %v1264_v22 = vmul.f32 %v4168_v56, %v1107_v16 }
 0x2a3   :  { %v2372_v2 = vmax.f32 %v2340_v12, 0.0  ;;  %v2341_v35 = vadd.f32 %v4327_v59, %v2282_v17  ;;  %v2995_v14 = vpop.f32.mrb[148].mxu1  ;;  %v1277_v21 = vadd.f32 %v1276_v60, %v1254_v5  ;;  %v1260_v17 = vmul.f32 %v4163_v31, %v4336_v62  ;;  %v1109_v60 = vpop.trf.xlu0 }
 0x2a4   :  { %v2996_v43 = vpop.f32.mrb[149].mxu1  ;;  %v1292_v7 = vadd.f32 %v1291_v24, %v1243_v52 }
 0x2a5   :  { %v2997_v20 = vadd.f32 %v2996_v43, %v2995_v14  ;;  %v2998_v30 = vpop.f32.mrb[150].mxu1  ;;  %2420 = vxpose.xlu1.b32.cont [9/16] %v2372_v2, 128  ;;  %v1134_v10 = vpop.trf.xlu1  ;;  %v2373_v40 = vmax.f32 %v2341_v35, 0.0  ;;  %v1278_v12 = vadd.f32 %v1277_v21, %v1256_v33  ;;  %v1262_v35 = vmul.f32 %v4232_v18, %v1106_v39 }
 0x2a6   :  { %v2999_v45 = vpop.f32.mrb[151].mxu1  ;;  %v1293_v14 = vadd.f32 %v1292_v7, %v1245_v42 }
 0x2a7   :  { %v2287_v63 = vadd.f32 %v4170_v0, %v2997_v20  ;;  %v3000_v47 = vadd.f32 %v2999_v45, %v2998_v30  ;;  %v1279_v46 = vadd.f32 %v1278_v12, %v1258_v26  ;;  %v1251_v20 = vmul.f32 %v4211_v54, %v4350_v49 }
 0x2a8   :  { %v1294_v32 = vadd.f32 %v1293_v14, %v1247_v9  ;;  %v1253_v45 = vmul.f32 %v4144_v53, %v1133_v51  ;;  %v1268_v54 = vmul.f32 %v4182_v44, %v1109_v60 }
 0x2a9   :  { %v2342_v27 = vadd.f32 %v4327_v59, %v2287_v63  ;;  %v2290_v38 = vadd.f32 %v4175_v25, %v3000_v47  ;;  %2421 = vxpose.xlu1.b32.cont [10/16] %v2373_v40, 128  ;;  %v1135_v0 = vpop.trf.xlu1  ;;  %v1249_v25 = vmul.f32 %v4140_v19, %v4343_v50  ;;  %v1280_v43 = vadd.f32 %v1279_v46, %v1260_v17 }
 0x2aa   :  { %2537 = vperm.xlu0 %3087, %v2459_v11   ;;  %v1266_v19 = vmul.f32 %v4239_v28, %v1108_v4  ;;  %v1255_v11 = vmul.f32 %v4219_v58, %v1134_v10  ;;  %v1257_v53 = vmul.f32 %v4157_v15, %v1135_v0 }
 0x2ab   :  { %v2374_v29 = vmax.f32 %v2342_v27, 0.0  ;;  %v2343_v2 = vadd.f32 %v4327_v59, %v2290_v38  ;;  %v3001_v48 = vpop.f32.mrb[152].mxu1  ;;  %v1281_v52 = vadd.f32 %v1280_v43, %v1262_v35  ;;  %v1295_v50 = vadd.f32 %v1294_v32, %v1249_v25 }
 0x2ac   :  { %v3002_v6 = vpop.f32.mrb[153].mxu1 }
 0x2ad   :  { %v3003_v5 = vadd.f32 %v3002_v6, %v3001_v48  ;;  %v3004_v36 = vpop.f32.mrb[154].mxu1  ;;  %2422 = vxpose.xlu1.b32.cont [11/16] %v2374_v29, 128  ;;  %v1136_v62 = vpop.trf.xlu1  ;;  %v2375_v33 = vmax.f32 %v2343_v2, 0.0  ;;  %v1282_v47 = vadd.f32 %v1281_v52, %v1264_v22  ;;  %v1296_v49 = vadd.f32 %v1295_v50, %v1251_v20 }
 0x2ae   :  { %v3005_v30 = vpop.f32.mrb[155].mxu1  ;;  %v1259_v17 = vmul.f32 %v4226_v55, %v1136_v62 }
 0x2af   :  { %v2295_v39 = vadd.f32 %v3003_v5, %v4197_v57  ;;  %v3006_v3 = vadd.f32 %v3005_v30, %v3004_v36  ;;  %v1283_v24 = vadd.f32 %v1282_v47, %v1266_v19  ;;  %v1297_v42 = vadd.f32 %v1296_v49, %v1253_v45 }
 0x2b1   :  { %v2344_v40 = vadd.f32 %v4327_v59, %v2295_v39  ;;  %v2298_v16 = vadd.f32 %v3006_v3, %v4201_v1  ;;  %2423 = vxpose.xlu1.b32.cont [12/16] %v2375_v33, 128  ;;  %v1137_v63 = vpop.trf.xlu1  ;;  %v1284_v38 = vadd.f32 %v1283_v24, %v1268_v54  ;;  %v1298_v12 = vadd.f32 %v1297_v42, %v1255_v11  ;;  %v4511_v54 = vld [vmem:[#allocation6_spill] sm:$0xff] }
 0x2b2   :  { %v1261_v2 = vmul.f32 %v4163_v31, %v1137_v63  ;;  %v3154_v3 = vmov 1966171168  }
 0x2b3   :  { %v2376_v57 = vmax.f32 %v2344_v40, 0.0  ;;  %v2345_v21 = vadd.f32 %v4327_v59, %v2298_v16  ;;  %v3007_v26 = vpop.f32.mrb[156].mxu1  ;;  %v1299_v29 = vadd.f32 %v1298_v12, %v1257_v53  ;;  %v1285_v46 = vrot.slane %v1284_v38, 4 }
 0x2b4   :  { %v3008_v51 = vpop.f32.mrb[157].mxu1  ;;  %v1319_v52 = vunpack.c.l.s4 %v3154_v3  ;;  %v4415_v40 = vstv %s4486_s7  ;;  %s3155_s7 = smov [#allocation3]  }
 0x2b5   :  { %v3009_v4 = vadd.f32 %v3008_v51, %v3007_v26  ;;  %v3010_v27 = vpop.f32.mrb[158].mxu1  ;;  %2424 = vxpose.xlu1.b32.cont [13/16] %v2376_v57, 128  ;;  %v1138_v1 = vpop.trf.xlu1  ;;  %v2377_v9 = vmax.f32 %v2345_v21, 0.0  ;;  %v1300_v35 = vadd.f32 %v1299_v29, %v1259_v17  ;;  %v1286_v36 = vadd.f32 %v1285_v46, %v1284_v38  ;;  %v4516_v46 = vld [vmem:[#allocation7_spill] sm:$0xff]  ;;  %s2641_s17 = sshll.u32 %s3155_s7, 4  ;;  %s2642_s17 = int_to_ptr.vmem [resolvable:$true] %s2641_s17 }
 0x2b6   :  { %v3011_v7 = vpop.f32.mrb[159].mxu1  ;;  %v1263_v14 = vmul.f32 %v4232_v18, %v1138_v1  ;;  %v4512_v26 = vlaneseq  ;;  %s3128_s3 = scalar_lea.vmem %s2642_s17, 64  ;;  %p3133_p1 = scmp.lt.s32.totalorder %s2642_s17, %s2642_s17 }
 0x2b7   :  { %v2303_v58 = vadd.f32 %v4194_v8, %v3009_v4  ;;  %v3012_v10 = vadd.f32 %v3011_v7, %v3010_v27  ;;  %v1301_v6 = vadd.f32 %v1300_v35, %v1261_v2  ;;  %v1287_v32 = vrot.slane %v1286_v36, 2  ;;  %p3129_p0 = scmp.ne.s32.totalorder %s2642_s17, %s3128_s3  ;;  %p3134_p2 = scmp.lt.s32.totalorder %s3128_s3, %s3128_s3 }
 0x2b8   :  { %vm4424_vm3 = vcmp.lt.s32.totalorder %v4512_v26, 256 }
 0x2b9   :  { %v2346_v48 = vadd.f32 %v4327_v59, %v2303_v58  ;;  %v2306_v15 = vadd.f32 %v4199_v37, %v3012_v10  ;;  %2425 = vxpose.xlu1.b32.cont [14/16] %v2377_v9, 128  ;;  %v1139_v0 = vpop.trf.xlu1  ;;  %v1302_v31 = vadd.f32 %v1301_v6, %v1263_v14  ;;  %v1288_v60 = vadd.f32 %v1287_v32, %v1286_v36  ;;  %p3135_p3 = por %p3134_p2, %p3133_p1 }
 0x2ba   :  { %v1265_v8 = vmul.f32 %v4168_v56, %v1139_v0 }
 0x2bb   :  { %v2378_v25 = vmax.f32 %v2346_v48, 0.0  ;;  %v2347_v55 = vadd.f32 %v4327_v59, %v2306_v15  ;;  %v1289_v39 = vrot.slane %v1288_v60, 1  ;;  %v4515_v15 = vld [vmem:[#allocation8_spill] sm:$0xff]  ;;  %p3136_p4 = pnand %p3135_p3, %p3129_p0 }
 0x2bc   :  { %v1303_v37 = vadd.f32 %v1302_v31, %v1265_v8  ;;  %v4517_v8 = vld [vmem:[#allocation9_spill] sm:$0xff] }
 0x2bd   :  { %2426 = vxpose.xlu1.b32.cont [15/16] %v2378_v25, 128  ;;  %v1140_v5 = vpop.trf.xlu1  ;;  %v2379_v43 = vmax.f32 %v2347_v55, 0.0  ;;  %v1290_v50 = vadd.f32 %v1289_v39, %v1288_v60 }
 0x2be   :  { %v1267_v62 = vmul.f32 %v4239_v28, %v1140_v5  ;;  %v1320_v28 = vunpack.c.0.s8 %v1319_v52 }
 0x2c0   :  { %v1304_v20 = vadd.f32 %v1303_v37, %v1267_v62  ;;  %v4420_v49 = vsub.s32 %v1320_v28, %v4511_v54  ;;  %v4518_v37 = vld [vmem:[#allocation10_spill] sm:$0xff] }
 0x2c1   :  { %2427 = vxpose.xlu1.b32.end [16/16] %v2379_v43, 128  ;;  %v1141_v22 = vpop.trf.xlu1 }
 0x2c2   :  { %v1269_v18 = vmul.f32 %v4182_v44, %v1141_v22  ;;  %v1313_v44 = vadd.f32 %v4415_v40, %v1290_v50 }
 0x2c4   :  { %v1305_v30 = vadd.f32 %v1304_v20, %v1269_v18 }
 0x2c5   :  { %v2396_v63 = vpop.trf.xlu0 }
 0x2c6   :  { %v1306_v59 = vrot.slane %v1305_v30, 4  ;;  %v2540_v35 = vmul.f32 %v4516_v46, %v2396_v63 }
 0x2c8   :  { %v1307_v33 = vadd.f32 %v1306_v59, %v1305_v30  ;;  %v4519_v59 = vld [vmem:[#allocation11_spill] sm:$0xff] }
 0x2c9   :  { %v2397_v21 = vpop.trf.xlu0 }
 0x2ca   :  { %v1308_v56 = vrot.slane %v1307_v33, 2  ;;  %v2542_v0 = vmul.f32 %v4515_v15, %v2397_v21 }
 0x2cc   :  { %v1309_v19 = vadd.f32 %v1308_v56, %v1307_v33  ;;  %v2572_v6 = vadd.f32 %v2542_v0, %v2540_v35 }
 0x2cd   :  { %v2398_v53 = vpop.trf.xlu0 }
 0x2ce   :  { %v1310_v45 = vrot.slane %v1309_v19, 1  ;;  %v2544_v14 = vmul.f32 %v4214_v34, %v2398_v53 }
 0x2d0   :  { %v1311_v16 = vadd.f32 %v1310_v45, %v1309_v19  ;;  %v2573_v36 = vadd.f32 %v2572_v6, %v2544_v14  ;;  %v4520_v45 = vld [vmem:[#allocation12_spill] sm:$0xff] }
 0x2d1   :  { %v2399_v51 = vpop.trf.xlu0 }
 0x2d2   :  { %v1314_v47 = vadd.f32 %v4415_v40, %v1311_v16  ;;  %v2546_v5 = vmul.f32 %v4517_v8, %v2399_v51 }
 0x2d4   :  { %v1317_v11 = vcombine.low %v1313_v44, %v1314_v47  ;;  %v2574_v43 = vadd.f32 %v2573_v36, %v2546_v5 }
 0x2d5   :  { %v2400_v4 = vpop.trf.xlu0 }
 0x2d6   :  { %v1324_v57 = vrot.slane %v1317_v11, %v4420_v49  ;;  %v2548_v31 = vmul.f32 %v4229_v61, %v2400_v4 }
 0x2d8   :  { %v1331_v42 = vrot.slane %v1324_v57, %v4420_v49  ;;  %v2575_v20 = vadd.f32 %v2574_v43, %v2548_v31 }
 0x2d9   :  { %v2401_v27 = vpop.trf.xlu0 }
 0x2da   :  { %1337 = vst.msk [vmem:[#allocation3] sm:$0x3] %vm4424_vm3, %v1331_v42  ;;  %v2550_v22 = vmul.f32 %v4518_v37, %v2401_v27  ;;  %v4521_v42 = vld [vmem:[#allocation13_spill] sm:$0xff] }
 0x2dc   :  { %v2576_v60 = vadd.f32 %v2575_v20, %v2550_v22 }
 0x2dd   :  { %v2402_v1 = vpop.trf.xlu0 }
 0x2de   :  { %v2552_v18 = vmul.f32 %v4242_v41, %v2402_v1  ;;  %v4522_v1 = vld [vmem:[#allocation14_spill] sm:$0xff] }
 0x2e0   :  { %v2577_v39 = vadd.f32 %v2576_v60, %v2552_v18 }
 0x2e1   :  { %v2403_v38 = vpop.trf.xlu0 }
 0x2e2   :  { %v2554_v33 = vmul.f32 %v4519_v59, %v2403_v38 }
 0x2e4   :  { %v2578_v50 = vadd.f32 %v2577_v39, %v2554_v33 }
 0x2e5   :  { %v2404_v12 = vpop.trf.xlu0 }
 0x2e6   :  { %v2556_v56 = vmul.f32 %v4257_v23, %v2404_v12 }
 0x2e8   :  { %v2579_v44 = vadd.f32 %v2578_v50, %v2556_v56 }
 0x2e9   :  { %v2405_v7 = vpop.trf.xlu0 }
 0x2ea   :  { %v2558_v28 = vmul.f32 %v4520_v45, %v2405_v7 }
 0x2ec   :  { %v2580_v26 = vadd.f32 %v2579_v44, %v2558_v28 }
 0x2ed   :  { %v2406_v58 = vpop.trf.xlu0 }
 0x2ee   :  { %v2560_v47 = vmul.f32 %v4270_v13, %v2406_v58 }
 0x2f0   :  { %v2581_v27 = vadd.f32 %v2580_v26, %v2560_v47 }
 0x2f1   :  { %v2407_v2 = vpop.trf.xlu0 }
 0x2f2   :  { %v2562_v53 = vmul.f32 %v4521_v42, %v2407_v2 }
 0x2f4   :  { %v2582_v7 = vadd.f32 %v2581_v27, %v2562_v53 }
 0x2f5   :  { %v2408_v25 = vpop.trf.xlu0 }
 0x2f6   :  { %v2564_v38 = vmul.f32 %v4522_v1, %v2408_v25 }
 0x2f8   :  { %v2583_v0 = vadd.f32 %v2582_v7, %v2564_v38 }
 0x2f9   :  { %v2409_v32 = vpop.trf.xlu0 }
 0x2fd   :  { %v2410_v52 = vpop.trf.xlu0 }
 0x301   :  { %v2411_v57 = vpop.trf.xlu0 }
 0x305   :  { %v2428_v17 = vpop.trf.xlu1 }
 0x306   :  { %v2541_v16 = vmul.f32 %v4516_v46, %v2428_v17  ;;  %v4524_v46 = vld [vmem:[#allocation16_spill] sm:$0xff] }
 0x307   :  { %v2568_v2 = vmul.f32 %v4524_v46, %v2410_v52 }
 0x309   :  { %v2429_v9 = vpop.trf.xlu1 }
 0x30a   :  { %v2543_v3 = vmul.f32 %v4515_v15, %v2429_v9  ;;  %v4523_v9 = vld [vmem:[#allocation15_spill] sm:$0xff] }
 0x30b   :  { %v2566_v58 = vmul.f32 %v4523_v9, %v2409_v32 }
 0x30c   :  { %v2593_v54 = vadd.f32 %v2543_v3, %v2541_v16 }
 0x30d   :  { %v2430_v10 = vpop.trf.xlu1  ;;  %v2584_v14 = vadd.f32 %v2583_v0, %v2566_v58 }
 0x30e   :  { %v2545_v63 = vmul.f32 %v4214_v34, %v2430_v10 }
 0x310   :  { %v2594_v51 = vadd.f32 %v2593_v54, %v2545_v63 }
 0x311   :  { %v2431_v29 = vpop.trf.xlu1 }
 0x312   :  { %v2547_v11 = vmul.f32 %v4517_v8, %v2431_v29  ;;  %v2585_v8 = vadd.f32 %v2584_v14, %v2568_v2 }
 0x314   :  { %v2595_v12 = vadd.f32 %v2594_v51, %v2547_v11 }
 0x315   :  { %v2432_v48 = vpop.trf.xlu1 }
 0x316   :  { %v2549_v4 = vmul.f32 %v4229_v61, %v2432_v48 }
 0x318   :  { %v2596_v10 = vadd.f32 %v2595_v12, %v2549_v4 }
 0x319   :  { %v2433_v55 = vpop.trf.xlu1 }
 0x31a   :  { %v2551_v34 = vmul.f32 %v4518_v37, %v2433_v55 }
 0x31c   :  { %v2597_v35 = vadd.f32 %v2596_v10, %v2551_v34 }
 0x31d   :  { %v2434_v62 = vpop.trf.xlu1 }
 0x31e   :  { %v2553_v29 = vmul.f32 %v4242_v41, %v2434_v62 }
 0x320   :  { %v2598_v25 = vadd.f32 %v2597_v35, %v2553_v29 }
 0x321   :  { %v2435_v30 = vpop.trf.xlu1 }
 0x322   :  { %v2555_v61 = vmul.f32 %v4519_v59, %v2435_v30 }
 0x324   :  { %v2599_v5 = vadd.f32 %v2598_v25, %v2555_v61 }
 0x325   :  { %v2436_v19 = vpop.trf.xlu1 }
 0x326   :  { %v2557_v6 = vmul.f32 %v4257_v23, %v2436_v19 }
 0x328   :  { %v2600_v43 = vadd.f32 %v2599_v5, %v2557_v6 }
 0x329   :  { %v2437_v21 = vpop.trf.xlu1  ;;  %v2538_v15 = vpop.permute.xlu0 %2537 }
 0x32a   :  { %v2570_v55 = vmul.f32 %v2538_v15, %v2411_v57  ;;  %v2559_v36 = vmul.f32 %v4520_v45, %v2437_v21 }
 0x32c   :  { %v2586_v41 = vadd.f32 %v2585_v8, %v2570_v55  ;;  %v2601_v37 = vadd.f32 %v2600_v43, %v2559_v36 }
 0x32d   :  { %v2438_v17 = vpop.trf.xlu1 }
 0x32e   :  { %v2561_v62 = vmul.f32 %v4270_v13, %v2438_v17  ;;  %v2587_v20 = vrot.slane %v2586_v41, 4 }
 0x330   :  { %v2602_v18 = vadd.f32 %v2601_v37, %v2561_v62  ;;  %v2588_v33 = vadd.f32 %v2587_v20, %v2586_v41 }
 0x331   :  { %v2439_v48 = vpop.trf.xlu1 }
 0x332   :  { %v2563_v22 = vmul.f32 %v4521_v42, %v2439_v48  ;;  %v2589_v19 = vrot.slane %v2588_v33, 2 }
 0x334   :  { %v2603_v60 = vadd.f32 %v2602_v18, %v2563_v22  ;;  %v2590_v28 = vadd.f32 %v2589_v19, %v2588_v33 }
 0x335   :  { %v2440_v31 = vpop.trf.xlu1 }
 0x336   :  { %v2565_v30 = vmul.f32 %v4522_v1, %v2440_v31  ;;  %v2591_v44 = vrot.slane %v2590_v28, 1 }
 0x338   :  { %v2604_v39 = vadd.f32 %v2603_v60, %v2565_v30  ;;  %v2592_v11 = vadd.f32 %v2591_v44, %v2590_v28 }
 0x339   :  { %v2441_v32 = vpop.trf.xlu1 }
 0x33a   :  { %v2567_v23 = vmul.f32 %v4523_v9, %v2441_v32  ;;  %v2614_v26 = vadd.f32 %v2592_v11, %v4415_v40 }
 0x33c   :  { %v2605_v3 = vadd.f32 %v2604_v39, %v2567_v23 }
 0x33d   :  { %v2442_v59 = vpop.trf.xlu1 }
 0x33e   :  { %v2569_v56 = vmul.f32 %v4524_v46, %v2442_v59 }
 0x340   :  { %v2606_v13 = vadd.f32 %v2605_v3, %v2569_v56 }
 0x341   :  { %v2443_v52 = vpop.trf.xlu1 }
 0x342   :  { %v2571_v50 = vmul.f32 %v2538_v15, %v2443_v52 }
 0x344   :  { %v2607_v45 = vadd.f32 %v2606_v13, %v2571_v50 }
 0x346   :  { %v2608_v16 = vrot.slane %v2607_v45, 4 }
 0x348   :  { %v2609_v63 = vadd.f32 %v2608_v16, %v2607_v45 }
 0x34a   :  { %v2610_v47 = vrot.slane %v2609_v63, 2 }
 0x34c   :  { %v2611_v54 = vadd.f32 %v2610_v47, %v2609_v63 }
 0x34e   :  { %v2612_v57 = vrot.slane %v2611_v54, 1 }
 0x350   :  { %v2613_v21 = vadd.f32 %v2612_v57, %v2611_v54 }
 0x352   :  { %v2615_v42 = vadd.f32 %v2613_v21, %v4415_v40 }
 0x354   :  { %v2618_v53 = vcombine.low %v2614_v26, %v2615_v42 }
 0x356   :  { %v2625_v51 = vrot.slane %v2618_v53, %v4420_v49 }
 0x358   :  { %v2632_v4 = vrot.slane %v2625_v51, %v4420_v49 }
 0x35a   :  { %2634 = vst.msk [vmem:[#allocation3 + $0x2] sm:$0x3] %vm4424_vm3, %v2632_v4 }
 0x35b   :  { %3139 = shalt.err (!%p3136_p4)
}
 0x35c   :  { %s3140_s20 = scalar_lea.hbm %s4487_s8, 64 }
 0x35d   :  { %p3141_p5 = scmp.ne.s32.totalorder %s4487_s8, %s3140_s20  ;;  %p3144_p6 = scmp.lt.u32.totalorder %s3140_s20, %s4487_s8 }
 0x35f   :  { %p3146_p7 = pnand %p3144_p6, %p3141_p5 }
 0x361   :  { %3149 = shalt.err (!%p3146_p7)
}
 0x362   :  { %2644 = dma.vmem_to_hbm [thread:$0]  %s2642_s17, 64, %s4487_s8, [#allocation4]  }
 0x363   :  { %3150 = dma.done.wait [#allocation4], 64  }
 0x364   :  { %3151 = vsyncadd [#allocation4], 4294967232 }
 0x365   :  { %2648 = vsyncpa [#allocation4], 1 }

</bundles_post_ra>
